<compile_context>
chip_gen: v6e
topology: v6e:2x2x1
jax: 0.10.0
libtpu: 0.0.40
codegen_flags: <defaults>
</compile_context>

<pallas_src>
import functools

import jax
import jax.numpy as jnp
from jax.experimental import pallas as pl
from jax.experimental.pallas import tpu as pltpu

DIMS = [28 * 28, 128, 64, 36, 18, 9, 18, 36, 64, 128, 28 * 28]
N_LAYERS = len(DIMS) - 1                               # 10 linear layers
RELU_LAYERS = frozenset([0, 1, 2, 3, 5, 6, 7, 8])      # ReLU after these; sigmoid after 9

IN_PAD = 896    # 784 padded to 7*128 (lane-dense K for the first matmul)
HID_PAD = 128   # every hidden width padded to one full vreg of lanes
OUT_PAD = 896   # 784 padded to 7*128 (lane-dense output → unmasked vst)


def _round_up(n, m):
    return ((n + m - 1) // m) * m


def autoencoder_kernel(x_ref, w0_ref, wmid_ref, w9_ref, bmid_ref, b9_ref, out_ref):
    # Layer 0: (TB, 896) @ (896, 128), bf16 operands, f32 MXU accumulation.
    h = jnp.dot(x_ref[...].astype(jnp.bfloat16), w0_ref[...],
                preferred_element_type=jnp.float32)
    h = jnp.maximum(h + bmid_ref[0:1, :], 0.0)

    # Layers 1..8: (TB, 128) @ (128, 128) in f32 (padded widths; FLOPs are negligible).
    for layer in range(1, 9):
        h = jnp.dot(h, wmid_ref[layer - 1], preferred_element_type=jnp.float32)
        h = h + bmid_ref[layer:layer + 1, :]
        if layer in RELU_LAYERS:      # layer 4 (18→9 latent) has no ReLU
            h = jnp.maximum(h, 0.0)

    # Layer 9: (TB, 128) @ (128, 896), bf16 operands, f32 accumulation, then sigmoid.
    h = jnp.dot(h.astype(jnp.bfloat16), w9_ref[...],
                preferred_element_type=jnp.float32)
    h = h + b9_ref[...]
    # sigmoid(h) = 1 / (1 + exp(-h)); exp and approx reciprocal both use the EUP slot.
    out_ref[...] = pl.reciprocal(1.0 + jnp.exp(-h), approx=True).astype(out_ref.dtype)


def make_params(key):
    """PyTorch nn.Linear-style init. W_l stored as (in, out); b_l as (1, out)."""
    weights, biases = [], []
    for i in range(N_LAYERS):
        key, wk, bk = jax.random.split(key, 3)
        fan_in, fan_out = DIMS[i], DIMS[i + 1]
        scale = 1.0 / jnp.sqrt(jnp.float32(fan_in))
        weights.append(jax.random.uniform(wk, (fan_in, fan_out), jnp.float32, -scale, scale))
        biases.append(jax.random.uniform(bk, (1, fan_out), jnp.float32, -scale, scale))
    return weights, biases


def pack_params(weights, biases):
    """Zero-pad to lane-friendly shapes and pack the 20 tensors into 5 slabs."""
    w0 = jnp.zeros((IN_PAD, HID_PAD), jnp.float32).at[:DIMS[0], :DIMS[1]].set(weights[0])
    w0 = w0.astype(jnp.bfloat16)                     # big layer → bf16
    wmid = jnp.zeros((8, HID_PAD, HID_PAD), jnp.float32)
    for layer in range(1, 9):
        wmid = wmid.at[layer - 1, :DIMS[layer], :DIMS[layer + 1]].set(weights[layer])
    w9 = jnp.zeros((HID_PAD, OUT_PAD), jnp.float32).at[:DIMS[9], :DIMS[10]].set(weights[9])
    w9 = w9.astype(jnp.bfloat16)                     # big layer → bf16
    bmid = jnp.zeros((9, HID_PAD), jnp.float32)
    for layer in range(9):
        bmid = bmid.at[layer, :DIMS[layer + 1]].set(biases[layer][0])
    b9 = jnp.zeros((1, OUT_PAD), jnp.float32).at[:, :DIMS[10]].set(biases[9])
    return w0, wmid, w9, bmid, b9


@functools.partial(jax.jit, static_argnames=("block_b",))
def autoencoder_forward(x, w0, wmid, w9, bmid, b9, *, block_b=1024):
    B = x.shape[0]
    TB = min(block_b, _round_up(B, 8))       # batch tile: multiple of 8 sublanes (f32)
    Bp = _round_up(B, TB)
    xp = jnp.zeros((Bp, IN_PAD), jnp.float32).at[:B, :DIMS[0]].set(x.astype(jnp.float32))

    const2 = lambda i: (0, 0)
    const3 = lambda i: (0, 0, 0)
    out = pl.pallas_call(
        autoencoder_kernel,
        out_shape=jax.ShapeDtypeStruct((Bp, OUT_PAD), jnp.float32),
        grid_spec=pltpu.PrefetchScalarGridSpec(
            num_scalar_prefetch=0,
            grid=(Bp // TB,),
            in_specs=[
                pl.BlockSpec((TB, IN_PAD), lambda i: (i, 0)),   # pipelined activations
                pl.BlockSpec((IN_PAD, HID_PAD), const2),        # resident params ↓
                pl.BlockSpec((8, HID_PAD, HID_PAD), const3),
                pl.BlockSpec((HID_PAD, OUT_PAD), const2),
                pl.BlockSpec((9, HID_PAD), const2),
                pl.BlockSpec((1, OUT_PAD), const2),
            ],
            out_specs=pl.BlockSpec((TB, OUT_PAD), lambda i: (i, 0)),
        ),
        compiler_params=pltpu.CompilerParams(
            dimension_semantics=("parallel",),   # shard batch tiles across TCs (v7x)
            vmem_limit_bytes=48 << 20,           # fits within v7x's 64 MiB physical VMEM
        ),
    )(xp, w0, wmid, w9, bmid, b9)
    return out[:B, :DIMS[-1]]


def reference_forward(x, weights, biases):
    """Plain-JAX reference with the same numerics (bf16 on the two big matmuls)."""
    h = x.astype(jnp.float32)
    for i in range(N_LAYERS):
        w, b = weights[i], biases[i]
        if i in (0, N_LAYERS - 1):
            h = jnp.dot(h.astype(jnp.bfloat16), w.astype(jnp.bfloat16),
                        preferred_element_type=jnp.float32)
        else:
            h = jnp.dot(h, w, preferred_element_type=jnp.float32,
                        precision=jax.lax.Precision.HIGHEST)
        h = h + b
        if i in RELU_LAYERS:
            h = jnp.maximum(h, 0.0)
    return jax.nn.sigmoid(h)


if __name__ == "__main__":
    key = jax.random.PRNGKey(0)
    key, xk, pk = jax.random.split(key, 3)

    batch = 24
    x = jax.random.normal(xk, (batch, 28 * 28), jnp.float32)
    weights, biases = make_params(pk)
    packed = pack_params(weights, biases)

    # block_b=8 → a 3-step batch grid: exercises the pipelined x/out blocks plus the
    # VMEM-resident (constant index_map) parameter slabs.
    out = autoencoder_forward(x, *packed, block_b=8)
    out = jax.block_until_ready(out)

    ref = reference_forward(x, weights, biases)
    assert out.shape == (batch, 28 * 28), out.shape
    err = float(jnp.max(jnp.abs(out - ref)))
    # Tolerance covers the EUP approx-reciprocal in the sigmoid; everything else
    # (padding, packing, bf16 casts) matches the reference numerics exactly.
    assert err < 1e-2, f"mismatch vs JAX reference: max abs err {err}"

    print("KERNEL_OK")
</pallas_src>

<mosaic_0001>
module attributes {stable_mosaic.version = 11 : i64} {
  func.func @autoencoder_kernel(%arg0: i32, %arg1: memref<8x896xf32, #tpu.memory_space<vmem>>, %arg2: memref<896x128xbf16, #tpu.memory_space<vmem>>, %arg3: memref<8x128x128xf32, #tpu.memory_space<vmem>>, %arg4: memref<128x896xbf16, #tpu.memory_space<vmem>>, %arg5: memref<9x128xf32, #tpu.memory_space<vmem>>, %arg6: memref<1x896xf32, #tpu.memory_space<vmem>>, %arg7: memref<8x896xf32, #tpu.memory_space<vmem>>) attributes {dimension_semantics = [#tpu.dimension_semantics<parallel>], iteration_bounds = array<i64: 3>, scalar_prefetch = 0 : i64, scratch_operands = 0 : i64, tpu.core_type = #tpu.core_type<tc>, window_params = [{transform_indices = @transform_0, window_bounds = array<i64: 8, 896>}, {pipeline_mode = #tpu.pipeline_mode<synchronous>, transform_indices = @transform_1, window_bounds = array<i64: 896, 128>}, {pipeline_mode = #tpu.pipeline_mode<synchronous>, transform_indices = @transform_2, window_bounds = array<i64: 8, 128, 128>}, {pipeline_mode = #tpu.pipeline_mode<synchronous>, transform_indices = @transform_3, window_bounds = array<i64: 128, 896>}, {pipeline_mode = #tpu.pipeline_mode<synchronous>, transform_indices = @transform_4, window_bounds = array<i64: 9, 128>}, {pipeline_mode = #tpu.pipeline_mode<synchronous>, transform_indices = @transform_5, window_bounds = array<i64: 1, 896>}, {transform_indices = @transform_6, window_bounds = array<i64: 8, 896>}]} {
    %c0 = arith.constant 0 : index
    %c0_0 = arith.constant 0 : index
    %0 = vector.load %arg1[%c0, %c0_0] : memref<8x896xf32, #tpu.memory_space<vmem>>, vector<8x896xf32>
    %1 = arith.truncf %0 : vector<8x896xf32> to vector<8x896xbf16>
    %c0_1 = arith.constant 0 : index
    %c0_2 = arith.constant 0 : index
    %2 = vector.load %arg2[%c0_1, %c0_2] : memref<896x128xbf16, #tpu.memory_space<vmem>>, vector<896x128xbf16>
    %cst = arith.constant dense<0.000000e+00> : vector<8x128xf32>
    %3 = tpu.matmul %1, %2, %cst {dimension_numbers = #tpu.dot_dimension_numbers<[1], [0], [0], [1], [0, 0, 1, 1], [], []>} : vector<8x896xbf16>, vector<896x128xbf16>, vector<8x128xf32> -> vector<8x128xf32>
    %c0_3 = arith.constant 0 : index
    %c0_4 = arith.constant 0 : index
    %4 = vector.load %arg5[%c0_3, %c0_4] : memref<9x128xf32, #tpu.memory_space<vmem>>, vector<1x128xf32>
    %5 = vector.broadcast %4 : vector<1x128xf32> to vector<8x128xf32>
    %6 = arith.addf %3, %5 : vector<8x128xf32>
    %cst_5 = arith.constant 0.000000e+00 : f32
    %7 = vector.broadcast %cst_5 : f32 to vector<8x128xf32>
    %8 = arith.maximumf %6, %7 : vector<8x128xf32>
    %c0_6 = arith.constant 0 : index
    %c0_7 = arith.constant 0 : index
    %c0_8 = arith.constant 0 : index
    %9 = vector.load %arg3[%c0_6, %c0_7, %c0_8] : memref<8x128x128xf32, #tpu.memory_space<vmem>>, vector<1x128x128xf32>
    %10 = vector.shape_cast %9 : vector<1x128x128xf32> to vector<128x128xf32>
    %cst_9 = arith.constant dense<0.000000e+00> : vector<8x128xf32>
    %11 = tpu.matmul %8, %10, %cst_9 {dimension_numbers = #tpu.dot_dimension_numbers<[1], [0], [0], [1], [0, 0, 1, 1], [], []>} : vector<8x128xf32>, vector<128x128xf32>, vector<8x128xf32> -> vector<8x128xf32>
    %c1 = arith.constant 1 : index
    %c0_10 = arith.constant 0 : index
    %12 = vector.load %arg5[%c1, %c0_10] : memref<9x128xf32, #tpu.memory_space<vmem>>, vector<1x128xf32>
    %13 = vector.broadcast %12 : vector<1x128xf32> to vector<8x128xf32>
    %14 = arith.addf %11, %13 : vector<8x128xf32>
    %cst_11 = arith.constant 0.000000e+00 : f32
    %15 = vector.broadcast %cst_11 : f32 to vector<8x128xf32>
    %16 = arith.maximumf %14, %15 : vector<8x128xf32>
    %c1_12 = arith.constant 1 : index
    %c0_13 = arith.constant 0 : index
    %c0_14 = arith.constant 0 : index
    %17 = vector.load %arg3[%c1_12, %c0_13, %c0_14] : memref<8x128x128xf32, #tpu.memory_space<vmem>>, vector<1x128x128xf32>
    %18 = vector.shape_cast %17 : vector<1x128x128xf32> to vector<128x128xf32>
    %cst_15 = arith.constant dense<0.000000e+00> : vector<8x128xf32>
    %19 = tpu.matmul %16, %18, %cst_15 {dimension_numbers = #tpu.dot_dimension_numbers<[1], [0], [0], [1], [0, 0, 1, 1], [], []>} : vector<8x128xf32>, vector<128x128xf32>, vector<8x128xf32> -> vector<8x128xf32>
    %c2 = arith.constant 2 : index
    %c0_16 = arith.constant 0 : index
    %20 = vector.load %arg5[%c2, %c0_16] : memref<9x128xf32, #tpu.memory_space<vmem>>, vector<1x128xf32>
    %21 = vector.broadcast %20 : vector<1x128xf32> to vector<8x128xf32>
    %22 = arith.addf %19, %21 : vector<8x128xf32>
    %cst_17 = arith.constant 0.000000e+00 : f32
    %23 = vector.broadcast %cst_17 : f32 to vector<8x128xf32>
    %24 = arith.maximumf %22, %23 : vector<8x128xf32>
    %c2_18 = arith.constant 2 : index
    %c0_19 = arith.constant 0 : index
    %c0_20 = arith.constant 0 : index
    %25 = vector.load %arg3[%c2_18, %c0_19, %c0_20] : memref<8x128x128xf32, #tpu.memory_space<vmem>>, vector<1x128x128xf32>
    %26 = vector.shape_cast %25 : vector<1x128x128xf32> to vector<128x128xf32>
    %cst_21 = arith.constant dense<0.000000e+00> : vector<8x128xf32>
    %27 = tpu.matmul %24, %26, %cst_21 {dimension_numbers = #tpu.dot_dimension_numbers<[1], [0], [0], [1], [0, 0, 1, 1], [], []>} : vector<8x128xf32>, vector<128x128xf32>, vector<8x128xf32> -> vector<8x128xf32>
    %c3 = arith.constant 3 : index
    %c0_22 = arith.constant 0 : index
    %28 = vector.load %arg5[%c3, %c0_22] : memref<9x128xf32, #tpu.memory_space<vmem>>, vector<1x128xf32>
    %29 = vector.broadcast %28 : vector<1x128xf32> to vector<8x128xf32>
    %30 = arith.addf %27, %29 : vector<8x128xf32>
    %cst_23 = arith.constant 0.000000e+00 : f32
    %31 = vector.broadcast %cst_23 : f32 to vector<8x128xf32>
    %32 = arith.maximumf %30, %31 : vector<8x128xf32>
    %c3_24 = arith.constant 3 : index
    %c0_25 = arith.constant 0 : index
    %c0_26 = arith.constant 0 : index
    %33 = vector.load %arg3[%c3_24, %c0_25, %c0_26] : memref<8x128x128xf32, #tpu.memory_space<vmem>>, vector<1x128x128xf32>
    %34 = vector.shape_cast %33 : vector<1x128x128xf32> to vector<128x128xf32>
    %cst_27 = arith.constant dense<0.000000e+00> : vector<8x128xf32>
    %35 = tpu.matmul %32, %34, %cst_27 {dimension_numbers = #tpu.dot_dimension_numbers<[1], [0], [0], [1], [0, 0, 1, 1], [], []>} : vector<8x128xf32>, vector<128x128xf32>, vector<8x128xf32> -> vector<8x128xf32>
    %c4 = arith.constant 4 : index
    %c0_28 = arith.constant 0 : index
    %36 = vector.load %arg5[%c4, %c0_28] : memref<9x128xf32, #tpu.memory_space<vmem>>, vector<1x128xf32>
    %37 = vector.broadcast %36 : vector<1x128xf32> to vector<8x128xf32>
    %38 = arith.addf %35, %37 : vector<8x128xf32>
    %c4_29 = arith.constant 4 : index
    %c0_30 = arith.constant 0 : index
    %c0_31 = arith.constant 0 : index
    %39 = vector.load %arg3[%c4_29, %c0_30, %c0_31] : memref<8x128x128xf32, #tpu.memory_space<vmem>>, vector<1x128x128xf32>
    %40 = vector.shape_cast %39 : vector<1x128x128xf32> to vector<128x128xf32>
    %cst_32 = arith.constant dense<0.000000e+00> : vector<8x128xf32>
    %41 = tpu.matmul %38, %40, %cst_32 {dimension_numbers = #tpu.dot_dimension_numbers<[1], [0], [0], [1], [0, 0, 1, 1], [], []>} : vector<8x128xf32>, vector<128x128xf32>, vector<8x128xf32> -> vector<8x128xf32>
    %c5 = arith.constant 5 : index
    %c0_33 = arith.constant 0 : index
    %42 = vector.load %arg5[%c5, %c0_33] : memref<9x128xf32, #tpu.memory_space<vmem>>, vector<1x128xf32>
    %43 = vector.broadcast %42 : vector<1x128xf32> to vector<8x128xf32>
    %44 = arith.addf %41, %43 : vector<8x128xf32>
    %cst_34 = arith.constant 0.000000e+00 : f32
    %45 = vector.broadcast %cst_34 : f32 to vector<8x128xf32>
    %46 = arith.maximumf %44, %45 : vector<8x128xf32>
    %c5_35 = arith.constant 5 : index
    %c0_36 = arith.constant 0 : index
    %c0_37 = arith.constant 0 : index
    %47 = vector.load %arg3[%c5_35, %c0_36, %c0_37] : memref<8x128x128xf32, #tpu.memory_space<vmem>>, vector<1x128x128xf32>
    %48 = vector.shape_cast %47 : vector<1x128x128xf32> to vector<128x128xf32>
    %cst_38 = arith.constant dense<0.000000e+00> : vector<8x128xf32>
    %49 = tpu.matmul %46, %48, %cst_38 {dimension_numbers = #tpu.dot_dimension_numbers<[1], [0], [0], [1], [0, 0, 1, 1], [], []>} : vector<8x128xf32>, vector<128x128xf32>, vector<8x128xf32> -> vector<8x128xf32>
    %c6 = arith.constant 6 : index
    %c0_39 = arith.constant 0 : index
    %50 = vector.load %arg5[%c6, %c0_39] : memref<9x128xf32, #tpu.memory_space<vmem>>, vector<1x128xf32>
    %51 = vector.broadcast %50 : vector<1x128xf32> to vector<8x128xf32>
    %52 = arith.addf %49, %51 : vector<8x128xf32>
    %cst_40 = arith.constant 0.000000e+00 : f32
    %53 = vector.broadcast %cst_40 : f32 to vector<8x128xf32>
    %54 = arith.maximumf %52, %53 : vector<8x128xf32>
    %c6_41 = arith.constant 6 : index
    %c0_42 = arith.constant 0 : index
    %c0_43 = arith.constant 0 : index
    %55 = vector.load %arg3[%c6_41, %c0_42, %c0_43] : memref<8x128x128xf32, #tpu.memory_space<vmem>>, vector<1x128x128xf32>
    %56 = vector.shape_cast %55 : vector<1x128x128xf32> to vector<128x128xf32>
    %cst_44 = arith.constant dense<0.000000e+00> : vector<8x128xf32>
    %57 = tpu.matmul %54, %56, %cst_44 {dimension_numbers = #tpu.dot_dimension_numbers<[1], [0], [0], [1], [0, 0, 1, 1], [], []>} : vector<8x128xf32>, vector<128x128xf32>, vector<8x128xf32> -> vector<8x128xf32>
    %c7 = arith.constant 7 : index
    %c0_45 = arith.constant 0 : index
    %58 = vector.load %arg5[%c7, %c0_45] : memref<9x128xf32, #tpu.memory_space<vmem>>, vector<1x128xf32>
    %59 = vector.broadcast %58 : vector<1x128xf32> to vector<8x128xf32>
    %60 = arith.addf %57, %59 : vector<8x128xf32>
    %cst_46 = arith.constant 0.000000e+00 : f32
    %61 = vector.broadcast %cst_46 : f32 to vector<8x128xf32>
    %62 = arith.maximumf %60, %61 : vector<8x128xf32>
    %c7_47 = arith.constant 7 : index
    %c0_48 = arith.constant 0 : index
    %c0_49 = arith.constant 0 : index
    %63 = vector.load %arg3[%c7_47, %c0_48, %c0_49] : memref<8x128x128xf32, #tpu.memory_space<vmem>>, vector<1x128x128xf32>
    %64 = vector.shape_cast %63 : vector<1x128x128xf32> to vector<128x128xf32>
    %cst_50 = arith.constant dense<0.000000e+00> : vector<8x128xf32>
    %65 = tpu.matmul %62, %64, %cst_50 {dimension_numbers = #tpu.dot_dimension_numbers<[1], [0], [0], [1], [0, 0, 1, 1], [], []>} : vector<8x128xf32>, vector<128x128xf32>, vector<8x128xf32> -> vector<8x128xf32>
    %c8 = arith.constant 8 : index
    %c0_51 = arith.constant 0 : index
    %66 = vector.load %arg5[%c8, %c0_51] : memref<9x128xf32, #tpu.memory_space<vmem>>, vector<1x128xf32>
    %67 = vector.broadcast %66 : vector<1x128xf32> to vector<8x128xf32>
    %68 = arith.addf %65, %67 : vector<8x128xf32>
    %cst_52 = arith.constant 0.000000e+00 : f32
    %69 = vector.broadcast %cst_52 : f32 to vector<8x128xf32>
    %70 = arith.maximumf %68, %69 : vector<8x128xf32>
    %71 = arith.truncf %70 : vector<8x128xf32> to vector<8x128xbf16>
    %c0_53 = arith.constant 0 : index
    %c0_54 = arith.constant 0 : index
    %72 = vector.load %arg4[%c0_53, %c0_54] : memref<128x896xbf16, #tpu.memory_space<vmem>>, vector<128x896xbf16>
    %cst_55 = arith.constant dense<0.000000e+00> : vector<8x896xf32>
    %73 = tpu.matmul %71, %72, %cst_55 {dimension_numbers = #tpu.dot_dimension_numbers<[1], [0], [0], [1], [0, 0, 1, 1], [], []>} : vector<8x128xbf16>, vector<128x896xbf16>, vector<8x896xf32> -> vector<8x896xf32>
    %c0_56 = arith.constant 0 : index
    %c0_57 = arith.constant 0 : index
    %74 = vector.load %arg6[%c0_56, %c0_57] : memref<1x896xf32, #tpu.memory_space<vmem>>, vector<1x896xf32>
    %75 = vector.broadcast %74 : vector<1x896xf32> to vector<8x896xf32>
    %76 = arith.addf %73, %75 : vector<8x896xf32>
    %cst_58 = arith.constant 0.000000e+00 : f32
    %77 = vector.broadcast %cst_58 : f32 to vector<8x896xf32>
    %78 = arith.subf %77, %76 : vector<8x896xf32>
    %79 = math.exp %78 : vector<8x896xf32>
    %cst_59 = arith.constant 1.000000e+00 : f32
    %80 = vector.broadcast %cst_59 : f32 to vector<8x896xf32>
    %81 = arith.addf %80, %79 : vector<8x896xf32>
    %82 = tpu.reciprocal %81 {approx = true} : vector<8x896xf32> -> vector<8x896xf32>
    %c0_60 = arith.constant 0 : index
    %c0_61 = arith.constant 0 : index
    %83 = vector.load %arg7[%c0_60, %c0_61] : memref<8x896xf32, #tpu.memory_space<vmem>>, vector<8x896xf32>
    tpu.vector_store %arg7[%c0_60, %c0_61], %82 {strides = array<i32>} : memref<8x896xf32, #tpu.memory_space<vmem>>, vector<8x896xf32>,
    return
  }
  func.func @transform_0(%arg0: i32) -> (i32, i32) {
    %c0_i32 = arith.constant 0 : i32
    %c0_i32_0 = arith.constant 0 : i32
    return %arg0, %c0_i32 : i32, i32
  }
  func.func @transform_1(%arg0: i32) -> (i32, i32) {
    %c0_i32 = arith.constant 0 : i32
    %c0_i32_0 = arith.constant 0 : i32
    %c0_i32_1 = arith.constant 0 : i32
    return %c0_i32, %c0_i32_0 : i32, i32
  }
  func.func @transform_2(%arg0: i32) -> (i32, i32, i32) {
    %c0_i32 = arith.constant 0 : i32
    %c0_i32_0 = arith.constant 0 : i32
    %c0_i32_1 = arith.constant 0 : i32
    %c0_i32_2 = arith.constant 0 : i32
    return %c0_i32, %c0_i32_0, %c0_i32_1 : i32, i32, i32
  }
  func.func @transform_3(%arg0: i32) -> (i32, i32) {
    %c0_i32 = arith.constant 0 : i32
    %c0_i32_0 = arith.constant 0 : i32
    %c0_i32_1 = arith.constant 0 : i32
    return %c0_i32, %c0_i32_0 : i32, i32
  }
  func.func @transform_4(%arg0: i32) -> (i32, i32) {
    %c0_i32 = arith.constant 0 : i32
    %c0_i32_0 = arith.constant 0 : i32
    %c0_i32_1 = arith.constant 0 : i32
    return %c0_i32, %c0_i32_0 : i32, i32
  }
  func.func @transform_5(%arg0: i32) -> (i32, i32) {
    %c0_i32 = arith.constant 0 : i32
    %c0_i32_0 = arith.constant 0 : i32
    %c0_i32_1 = arith.constant 0 : i32
    return %c0_i32, %c0_i32_0 : i32, i32
  }
  func.func @transform_6(%arg0: i32) -> (i32, i32) {
    %c0_i32 = arith.constant 0 : i32
    %c0_i32_0 = arith.constant 0 : i32
    return %arg0, %c0_i32 : i32, i32
  }
}

</mosaic_0001>

<bundles_post_ra>
// kernel: autoencoder_forward.1
= control target key start
LH: loop header
LB: loop body
LE: loop exit
PB: predicated region body
PF: predicated region fallthrough
CT: control target
= control target key end

     0   :  { %11 = vsyncpa [#allocation3], 0  ;;  %s3941_s0 = inlined_call_operand.vmem [shape: f32[24,896], index: 0, kind: input, shape index: {}]   ;;  %s3942_s1 = inlined_call_operand.vmem [shape: bf16[896,128], index: 1, kind: input, shape index: {}]   ;;  %s3943_s2 = inlined_call_operand.hbm [shape: f32[8,128,128], index: 2, kind: input, shape index: {}]   ;;  %s3944_s3 = inlined_call_operand.hbm [shape: bf16[128,896], index: 3, kind: input, shape index: {}]   ;;  %s3945_s4 = inlined_call_operand.vmem [shape: f32[9,128], index: 4, kind: input, shape index: {}]   ;;  %s3946_s5 = inlined_call_operand.vmem [shape: f32[1,896], index: 5, kind: input, shape index: {}]   ;;  %s3947_s6 = inlined_call_operand.hbm [shape: f32[24,896], index: 6, kind: output, shape index: {}]  }
   0x1   :  { %12 = vsyncpa [#allocation6], 0 }
   0x2   :  { %13 = vsyncpa [#allocation4], 0 }
   0x3   :  { %15 = vsyncpa [#allocation4 + $0x1], 0  ;;  %s3416_s21 = smov 0   ;;  %s3418_s22 = smov 0  }
   0x4   :  { %s3420_s23 = smov 0   ;;  %s3422_s24 = smov 0  }
   0x5 LB: > { %s3437_s25 = sadd.s32 4294967295, %s3369_s24   ;;  %s2342_s26 = sadd.s32 4294967294, %s3369_s24   ;;  %s3369_s24 = sphi %s3422_s24, %s3961_s24   ;;  %s3365_s23 = sphi %s3420_s23, %s3960_s23   ;;  %s3361_s22 = sphi %s3418_s22, %s3959_s22   ;;  %s3357_s21 = sphi %s3416_s21, %s3958_s21  }
   0x6   : > { %s3441_s27 = sadd.s32 1, %s3369_s24   ;;  %s159_s28 = sadd.s32 1, %s3365_s23 }
   0x7   : > { %s156_s29 = ssub.s32 %s3369_s24, %s3441_s27  ;;  %p169_p0 = scmp.ne.s32.totalorder %s3365_s23, %s3361_s22 }
   0x8   : > { %p157_p1 = scmp.eq.s32.totalorder %s156_s29, 0  ;;  %p170_p2 = scmp.eq.s32.totalorder %s3437_s25, 2 }
   0x9   : > { %p175_p3 = scmp.ne.s32.totalorder %s3361_s22, %s3357_s21  ;;  %p176_p4 = scmp.eq.s32.totalorder %s2342_s26, 2 }
   0xa   : > { %s3452_s30 = scalar_select %p157_p1, %s3365_s23, %s159_s28  }
   0xb   : > { %p3454_p5 = por %p170_p2, %p169_p0  ;;  %p3458_p6 = por %p176_p4, %p175_p3 }
   0xc   : > { %p2343_p7 = scmp.ge.s32.totalorder %s3369_s24, 1  ;;  %p183_p8 = scmp.lt.s32.totalorder %s3369_s24, 4 }
   0xd   : > { %s3950_s8 = scalar_select %p3458_p6, 1, 0 }
   0xe   : > { %p3948_p9 = scmp.eq.s32.totalorder %s3437_s25, 0  ;;  %p3465_p10 = pnand %p2343_p7, %p183_p8 }
   0xf   : > { %s3371_s10 = smov [#allocation2]   ;;  %s3372_s13 = smov [#allocation5]  }
  0x10   : > { %s198_s11 = sshll.u32 %s3371_s10, 4  ;;  %p3028_p11 = pneg %p3465_p10  ;;  %s199_s11 = int_to_ptr.vmem [resolvable:$true] %s198_s11 }
  0x11   : > { %s211_s14 = sshll.u32 %s3372_s13, 4  ;;  %s3260_s15 = scalar_lea.vmem %s199_s11, 16384  ;;  %s212_s14 = int_to_ptr.vmem [resolvable:$true] %s211_s14 }
  0x12   : > { %p3473_p12 = pnand %p3948_p9, %p3028_p11  ;;  %p3261_p0 = scmp.ne.s32.totalorder %s199_s11, %s3260_s15 }
  0x13   : > { %p3268_p3 = scmp.lt.s32.totalorder %s199_s11, %s199_s11  ;;  %p3269_p4 = scmp.lt.s32.totalorder %s3260_s15, %s3260_s15 }
  0x14   : > { %p3251_p13 = pneg %p3473_p12 }
  0x15   : > { %p3270_p7 = por %p3269_p4, %p3268_p3 }
  0x16   : > { %p3263_p1 = pnand %p3261_p0, %p3251_p13 }
  0x18   : > { %p3264_p2 = pneg %p3263_p1 }
  0x1a   : > { %p3271_p8 = pnand %p3270_p7, %p3264_p2 }
  0x1c   : > { %3274 = shalt.err (!%p3271_p8)
}
  0x1d   : > { %s3373_s16 = smov 128   ;;  %s3374_s17 = smov 8  }
  0x1e   : > { %3031 = dma.hbm_to_vmem [thread:$0]  (!%p3473_p12), %s3943_s2, 16384, %s199_s11, [#allocation3], %s3373_s16, %s3373_s16, %s3374_s17  }
  0x1f   : > { %s3286_s20 = scalar_lea.vmem %s212_s14, 7168  ;;  %p3294_p9 = scmp.lt.s32.totalorder %s212_s14, %s212_s14 }
  0x20   : > { %p3287_p11 = scmp.ne.s32.totalorder %s212_s14, %s3286_s20  ;;  %p3295_p6 = scmp.lt.s32.totalorder %s3286_s20, %s3286_s20 }
  0x22   : > { %p3289_p0 = pnand %p3287_p11, %p3251_p13  ;;  %p3296_p3 = por %p3295_p6, %p3294_p9 }
  0x24   : > { %p3290_p1 = pneg %p3289_p0 }
  0x26   : > { %p3297_p2 = pnand %p3296_p3, %p3290_p1 }
  0x28   : > { %3300 = shalt.err (!%p3297_p2)
}
  0x29   : > { %s3375_s26 = smov 448   ;;  %s3376_s28 = smov 28  }
  0x2a   : > { %3034 = dma.hbm_to_vmem [thread:$0]  (!%p3473_p12), %s3944_s3, 7168, %s212_s14, [#allocation6], %s3375_s26, %s3375_s26, %s3376_s28  }
  0x2b   : > { %241 = sbr.rel (%p3465_p10) target bundleno = 2173 (0x87d), region = 44  ;;  %p3953_p4 = scmp.eq.s32.totalorder (!%p3465_p10), %s3437_s25, 0 }
  0x30   : > { %3344 = dma.done.wait (%p3953_p4), [#allocation3], 16384   ;;  %p3954_p13 = pmov %p3953_p4 }
  0x31   : > { %p3955_p6 = pmov %p3953_p4 }
  0x32   : > { %3346 = vsyncadd (%p3954_p13), [#allocation3], 4294950912 }
  0x33   : > { %3348 = dma.done.wait (%p3955_p6), [#allocation6], 7168   ;;  %p3956_p9 = pmov %p3953_p4 }
  0x34   : > { %v3085_v0 = vld [vmem:[%s3942_s1 + $0x78] sm:$0xff]   ;;  %v3089_v4 = vld [vmem:[%s3942_s1 + $0x70] sm:$0xff]   ;;  %v3093_v8 = vld [vmem:[%s3942_s1 + $0x68] sm:$0xff]   ;;  %p275_p10 = scmp.lt.s32.totalorder %s3437_s25, 2  ;;  %v3377_v39 = vmov 0.0   ;;  %vm3378_vm0 = vmmov 0  }
  0x35   : > { %3350 = vsyncadd (%p3956_p9), [#allocation6], 4294960128  ;;  %v3086_v1 = vld [vmem:[%s3942_s1 + $0xf8] sm:$0xff]   ;;  %2475 = vmatprep.subr.bf16.mxu0 %v3085_v0  ;;  %v3090_v5 = vld [vmem:[%s3942_s1 + $0xf0] sm:$0xff]   ;;  %s272_s15 = sand.u32 1, %s3361_s22   ;;  %s3017_s19 = smul.u32 896, %s3437_s25 }
  0x36   : > { %v3087_v2 = vld [vmem:[%s3942_s1 + $0x38] sm:$0xff]   ;;  %2497 = vmatprep.subr.bf16.mxu1 %v3086_v1  ;;  %v3091_v6 = vld [vmem:[%s3942_s1 + $0x30] sm:$0xff]   ;;  %v3094_v9 = vld [vmem:[%s3942_s1 + $0xe8] sm:$0xff]   ;;  %s276_s10 = scalar_select %p275_p10, %s3437_s25, 2 }
  0x37   : > { %v3088_v3 = vld [vmem:[%s3942_s1 + $0xb8] sm:$0xff]   ;;  %2476 = vmatpush3.bf16.msra.mxu0 %v3087_v2  ;;  %v3092_v7 = vld [vmem:[%s3942_s1 + $0xb0] sm:$0xff]   ;;  %v3095_v10 = vld [vmem:[%s3942_s1 + $0x28] sm:$0xff]   ;;  %s3015_s16 = smul.u32 56, %s272_s15  ;;  %s3896_s28 = scalar_lea.hbm %s3947_s6, %s3017_s19 }
  0x38   : > { %2498 = vmatpush3.bf16.msra.mxu1 %v3088_v3  ;;  %2477 = vmatprep.subr.bf16.mxu0 %v3089_v4  ;;  %v3096_v11 = vld [vmem:[%s3942_s1 + $0xa8] sm:$0xff]   ;;  %v3097_v12 = vld [vmem:[%s3942_s1 + $0x60] sm:$0xff]   ;;  %v3101_v16 = vld [vmem:[%s3942_s1 + $0x58] sm:$0xff]   ;;  %s3016_s18 = smul.u32 56, %s276_s10  ;;  %s2247_s29 = scalar_lea.sflag [#allocation4], %s272_s15 }
  0x39   : > { %2499 = vmatprep.subr.bf16.mxu1 %v3090_v5  ;;  %v3098_v13 = vld [vmem:[%s3942_s1 + $0xe0] sm:$0xff]   ;;  %v3102_v17 = vld [vmem:[%s3942_s1 + $0xd8] sm:$0xff]   ;;  %v3105_v20 = vld [vmem:[%s3942_s1 + $0x50] sm:$0xff]   ;;  %s3884_s17 = scalar_lea.vmem [#allocation7], %s3015_s16  ;;  %s3380_s11 = smov [#allocation7]  }
  0x3a   : > { %v3099_v14 = vld [vmem:[%s3942_s1 + $0x20] sm:$0xff]   ;;  %v3103_v18 = vld [vmem:[%s3942_s1 + $0x18] sm:$0xff]   ;;  %v3106_v21 = vld [vmem:[%s3942_s1 + $0xd0] sm:$0xff]   ;;  %s3600_s9 = scalar_lea.vmem %s3941_s0, %s3016_s18  ;;  %s2261_s18 = sshll.u32 %s3884_s17, 4  ;;  %s3898_s18 = int_to_ptr.vmem [resolvable:$true] %s2261_s18 }
  0x3b   : > { %2478 = vmatpush3.bf16.msra.mxu0 %v3091_v6  ;;  %v3100_v15 = vld [vmem:[%s3942_s1 + $0xa0] sm:$0xff]   ;;  %v3104_v19 = vld [vmem:[%s3942_s1 + $0x98] sm:$0xff]   ;;  %v3107_v22 = vld [vmem:[%s3942_s1 + $0x10] sm:$0xff]   ;;  %s3301_s25 = scalar_lea.vmem %s3898_s18, 896 }
  0x3c   : > { %2500 = vmatpush3.bf16.msra.mxu1 %v3092_v7  ;;  %2479 = vmatprep.subr.bf16.mxu0 %v3093_v8  ;;  %v3108_v23 = vld [vmem:[%s3942_s1 + $0x90] sm:$0xff]   ;;  %v3109_v24 = vld [vmem:[%s3942_s1 + $0x48] sm:$0xff]   ;;  %v3113_v28 = vld [vmem:[%s3942_s1 + $0x40] sm:$0xff]   ;;  %p3302_p12 = scmp.ne.s32.totalorder %s3898_s18, %s3301_s25 }
  0x3d   : > { %2501 = vmatprep.subr.bf16.mxu1 %v3094_v9  ;;  %v3110_v25 = vld [vmem:[%s3942_s1 + $0xc8] sm:$0xff]   ;;  %v3114_v29 = vld [vmem:[%s3942_s1 + $0xc0] sm:$0xff]   ;;  %v284_v34 = vld [vmem:[%s3600_s9 + $0x18] sm:$0xff] }
  0x3e   : > { %v3111_v26 = vld [vmem:[%s3942_s1 + $0x8] sm:$0xff]   ;;  %v3115_v30 = vld [vmem:[%s3942_s1] sm:$0xff]   ;;  %v291_v37 = vpack.c.bf16 %v284_v34, %v284_v34  ;;  %v3117_v38 = vld [vmem:[%s3942_s1 + $0x178] sm:$0xff]   ;;  %p3303_p7 = pnand %p3302_p12, %p3454_p5 }
  0x3f   : > { %2480 = vmatpush3.bf16.msra.mxu0 %v3095_v10  ;;  %v3112_v27 = vld [vmem:[%s3942_s1 + $0x88] sm:$0xff]   ;;  %v3116_v31 = vld [vmem:[%s3942_s1 + $0x80] sm:$0xff]   ;;  %v283_v40 = vld [vmem:[%s3600_s9 + $0x10] sm:$0xff] }
  0x40   : > { %2502 = vmatpush3.bf16.msra.mxu1 %v3096_v11  ;;  %2481 = vmatprep.subr.bf16.mxu0 %v3097_v12  ;;  %v282_v32 = vld [vmem:[%s3600_s9 + $0x8] sm:$0xff]  ;;  %v281_v33 = vld [vmem:[%s3600_s9] sm:$0xff]  ;;  %v290_v41 = vpack.c.bf16 %v283_v40, %v283_v40  ;;  %v3118_v42 = vld [vmem:[%s3942_s1 + $0x138] sm:$0xff]   ;;  %p3304_p8 = pneg %p3303_p7 }
  0x41   : > { %2503 = vmatprep.subr.bf16.mxu1 %v3098_v13  ;;  %v289_v35 = vpack.c.bf16 %v282_v32, %v282_v32  ;;  %v288_v36 = vpack.c.bf16 %v281_v33, %v281_v33  ;;  %820 = vmatprep.mubr.bf16.mxu1 %v291_v37  ;;  %v3119_v43 = vld [vmem:[%s3942_s1 + $0x1b8] sm:$0xff]   ;;  %v3120_v44 = vld [vmem:[%s3942_s1 + $0x170] sm:$0xff]   ;;  %v3123_v47 = vld [vmem:[%s3942_s1 + $0x168] sm:$0xff]  }
  0x42   : > { %v3121_v45 = vld [vmem:[%s3942_s1 + $0x130] sm:$0xff]   ;;  %v3124_v48 = vld [vmem:[%s3942_s1 + $0x128] sm:$0xff]   ;;  %v3126_v50 = vld [vmem:[%s3942_s1 + $0x160] sm:$0xff]  }
  0x43   : > { %2482 = vmatpush3.bf16.msra.mxu0 %v3099_v14  ;;  %780 = vmatprep.mubr.bf16.mxu0 %v289_v35  ;;  %v3122_v46 = vld [vmem:[%s3942_s1 + $0x1b0] sm:$0xff]   ;;  %v3125_v49 = vld [vmem:[%s3942_s1 + $0x1a8] sm:$0xff]   ;;  %v3127_v51 = vld [vmem:[%s3942_s1 + $0x120] sm:$0xff]  }
  0x44   : > { %2504 = vmatpush3.bf16.msra.mxu1 %v3100_v15  ;;  %2483 = vmatprep.subr.bf16.mxu0 %v3101_v16  ;;  %v3128_v52 = vld [vmem:[%s3942_s1 + $0x1a0] sm:$0xff]   ;;  %v3129_v53 = vld [vmem:[%s3942_s1 + $0x158] sm:$0xff]   ;;  %v3132_v56 = vld [vmem:[%s3942_s1 + $0x150] sm:$0xff]  }
  0x45   : > { %2505 = vmatprep.subr.bf16.mxu1 %v3102_v17  ;;  %v3130_v54 = vld [vmem:[%s3942_s1 + $0x118] sm:$0xff]   ;;  %v3133_v57 = vld [vmem:[%s3942_s1 + $0x110] sm:$0xff]   ;;  %v3135_v59 = vld [vmem:[%s3942_s1 + $0x148] sm:$0xff]  }
  0x46   : > { %v3131_v55 = vld [vmem:[%s3942_s1 + $0x198] sm:$0xff]   ;;  %v3134_v58 = vld [vmem:[%s3942_s1 + $0x190] sm:$0xff]   ;;  %v3136_v60 = vld [vmem:[%s3942_s1 + $0x108] sm:$0xff]  }
  0x47   : > { %2484 = vmatpush3.bf16.msra.mxu0 %v3103_v18  ;;  %v3137_v61 = vld [vmem:[%s3942_s1 + $0x188] sm:$0xff]   ;;  %v3138_v63 = vld [vmem:[%s3942_s1 + $0x140] sm:$0xff]   ;;  %v287_v4 = vld [vmem:[%s3600_s9 + $0x30] sm:$0xff] }
  0x48   : > { %2506 = vmatpush3.bf16.msra.mxu1 %v3104_v19  ;;  %2485 = vmatprep.subr.bf16.mxu0 %v3105_v20  ;;  %v286_v62 = vld [vmem:[%s3600_s9 + $0x28] sm:$0xff]  ;;  %v3139_v1 = vld [vmem:[%s3942_s1 + $0x100] sm:$0xff]   ;;  %v294_v6 = vpack.c.bf16 %v287_v4, %v287_v4  ;;  %v924_v7 = vld [vmem:[#allocation2 + $0x78] sm:$0xff] }
  0x49   : > { %2507 = vmatprep.subr.bf16.mxu1 %v3106_v21  ;;  %v293_v0 = vpack.c.bf16 %v286_v62, %v286_v62  ;;  %v285_v2 = vld [vmem:[%s3600_s9 + $0x20] sm:$0xff]  ;;  %v923_v8 = vld [vmem:[#allocation2 + $0x70] sm:$0xff]  ;;  %v922_v9 = vld [vmem:[#allocation2 + $0x68] sm:$0xff]  ;;  %s3305_s9 = sshll.u32 %s3380_s11, 4  ;;  %s3306_s9 = int_to_ptr.vmem [resolvable:$false] %s3305_s9 }
  0x4a   : > { %v3140_v3 = vld [vmem:[%s3942_s1 + $0x180] sm:$0xff]   ;;  %v292_v5 = vpack.c.bf16 %v285_v2, %v285_v2  ;;  %v920_v11 = vld [vmem:[#allocation2 + $0x58] sm:$0xff]  ;;  %v919_v12 = vld [vmem:[#allocation2 + $0x50] sm:$0xff]  ;;  %s3307_s12 = scalar_lea.vmem %s3306_s9, 1792  ;;  %p3308_p11 = scmp.lt.s32.totalorder %s3898_s18, %s3306_s9 }
  0x4b   : > { %2486 = vmatpush3.bf16.msra.mxu0 %v3107_v22  ;;  %v921_v10 = vld [vmem:[#allocation2 + $0x60] sm:$0xff]  ;;  %v918_v13 = vld [vmem:[#allocation2 + $0x48] sm:$0xff]  ;;  %v916_v15 = vld [vmem:[#allocation2 + $0x38] sm:$0xff]  ;;  %p3309_p0 = scmp.lt.s32.totalorder %s3307_s12, %s3301_s25 }
  0x4c   : > { %2508 = vmatpush3.bf16.msra.mxu1 %v3108_v23  ;;  %2487 = vmatprep.subr.bf16.mxu0 %v3109_v24  ;;  %v917_v14 = vld [vmem:[#allocation2 + $0x40] sm:$0xff]  ;;  %v915_v16 = vld [vmem:[#allocation2 + $0x30] sm:$0xff]  ;;  %v914_v17 = vld [vmem:[#allocation2 + $0x28] sm:$0xff] }
  0x4d   : > { %2509 = vmatprep.subr.bf16.mxu1 %v3110_v25  ;;  %v913_v18 = vld [vmem:[#allocation2 + $0x20] sm:$0xff]  ;;  %v912_v19 = vld [vmem:[#allocation2 + $0x18] sm:$0xff]  ;;  %v911_v20 = vld [vmem:[#allocation2 + $0x10] sm:$0xff]  ;;  %p3310_p1 = por %p3309_p0, %p3308_p11 }
  0x4e   : > { %v910_v21 = vld [vmem:[#allocation2 + $0x8] sm:$0xff]  ;;  %v909_v22 = vld [vmem:[#allocation2] sm:$0xff]  ;;  %v1017_v23 = vld [vmem:[#allocation2 + $0xf8] sm:$0xff] }
  0x4f   : > { %2488 = vmatpush3.bf16.msra.mxu0 %v3111_v26  ;;  %v1016_v24 = vld [vmem:[#allocation2 + $0xf0] sm:$0xff]  ;;  %v1015_v25 = vld [vmem:[#allocation2 + $0xe8] sm:$0xff]  ;;  %v1014_v26 = vld [vmem:[#allocation2 + $0xe0] sm:$0xff]  ;;  %p3311_p3 = pnand %p3310_p1, %p3304_p8 }
  0x50   : > { %2510 = vmatpush3.bf16.msra.mxu1 %v3112_v27  ;;  %2489 = vmatprep.subr.bf16.mxu0 %v3113_v28  ;;  %v1013_v27 = vld [vmem:[#allocation2 + $0xd8] sm:$0xff]  ;;  %v1012_v28 = vld [vmem:[#allocation2 + $0xd0] sm:$0xff]  ;;  %v1007_v33 = vld [vmem:[#allocation2 + $0xa8] sm:$0xff] }
  0x51   : > { %2511 = vmatprep.subr.bf16.mxu1 %v3114_v29  ;;  %v1011_v29 = vld [vmem:[#allocation2 + $0xc8] sm:$0xff]  ;;  %v1008_v32 = vld [vmem:[#allocation2 + $0xb0] sm:$0xff]  ;;  %v1006_v34 = vld [vmem:[#allocation2 + $0xa0] sm:$0xff] }
  0x52   : > { %v1005_v35 = vld [vmem:[#allocation2 + $0x98] sm:$0xff]  ;;  %v1004_v62 = vld [vmem:[#allocation2 + $0x90] sm:$0xff]  ;;  %v1107_v4 = vld [vmem:[#allocation2 + $0x160] sm:$0xff] }
  0x53   : > { %2490 = vmatpush3.bf16.msra.mxu0 %v3115_v30  ;;  %v1010_v30 = vld [vmem:[#allocation2 + $0xc0] sm:$0xff]  ;;  %v1109_v2 = vld [vmem:[#allocation2 + $0x170] sm:$0xff] }
  0x54   : > { %2512 = vmatpush3.bf16.msra.mxu1 %v3116_v31  ;;  %2519 = vmatprep.subr.bf16.mxu0 %v3117_v38  ;;  %v1009_v31 = vld [vmem:[#allocation2 + $0xb8] sm:$0xff] }
  0x55   : > { %2695 = vmatprep.subr.bf16.mxu1 %v3377_v39 }
  0x56   : > { %781 = vmatmul.mubr.bf16.vlgmr.msra.gmra.mxu0 %v288_v36 }
  0x57   : > { %821 = vmatmul.mubr.bf16.vlgmr.msra.gmra.mxu1 %v290_v41  ;;  %2520 = vmatpush3.bf16.msra.mxu0 %v3118_v42 }
  0x58   : > { %2696 = vmatpush3.bf16.msra.mxu1 %v3119_v43  ;;  %2711 = vmatprep.mubr.msk.bf16.mxu1 %vm3378_vm0, %v3377_v39 }
  0x59   : > { %2521 = vmatprep.subr.bf16.mxu0 %v3120_v44  ;;  %2697 = vmatprep.subr.bf16.mxu1 %v3377_v39 }
  0x5a   : > { %860 = vmatprep.mubr.bf16.mxu0 %v293_v0  ;;  %v1002_v0 = vld [vmem:[#allocation2 + $0x80] sm:$0xff] }
  0x5b   : > { %2522 = vmatpush3.bf16.msra.mxu0 %v3121_v45 }
  0x5c   : > { %2698 = vmatpush3.bf16.msra.mxu1 %v3122_v46  ;;  %2523 = vmatprep.subr.bf16.mxu0 %v3123_v47  ;;  %v2351_v46 = vld [vmem:[%s3945_s4] ss:$0 sm:$0xff] }
  0x5d   : > { %2699 = vmatprep.subr.bf16.mxu1 %v3377_v39 }
  0x5f   : > { %2524 = vmatpush3.bf16.msra.mxu0 %v3124_v48 }
  0x60   : > { %2700 = vmatpush3.bf16.msra.mxu1 %v3125_v49  ;;  %2525 = vmatprep.subr.bf16.mxu0 %v3126_v50 }
  0x61   : > { %2701 = vmatprep.subr.bf16.mxu1 %v3377_v39 }
  0x63   : > { %2526 = vmatpush3.bf16.msra.mxu0 %v3127_v51 }
  0x64   : > { %2702 = vmatpush3.bf16.msra.mxu1 %v3128_v52  ;;  %2527 = vmatprep.subr.bf16.mxu0 %v3129_v53 }
  0x65   : > { %2703 = vmatprep.subr.bf16.mxu1 %v3377_v39 }
  0x67   : > { %2528 = vmatpush3.bf16.msra.mxu0 %v3130_v54 }
  0x68   : > { %2704 = vmatpush3.bf16.msra.mxu1 %v3131_v55  ;;  %2529 = vmatprep.subr.bf16.mxu0 %v3132_v56 }
  0x69   : > { %2705 = vmatprep.subr.bf16.mxu1 %v3377_v39 }
  0x6b   : > { %2530 = vmatpush3.bf16.msra.mxu0 %v3133_v57 }
  0x6c   : > { %2706 = vmatpush3.bf16.msra.mxu1 %v3134_v58  ;;  %2531 = vmatprep.subr.bf16.mxu0 %v3135_v59 }
  0x6d   : > { %2707 = vmatprep.subr.bf16.mxu1 %v3377_v39 }
  0x6f   : > { %2532 = vmatpush3.bf16.msra.mxu0 %v3136_v60 }
  0x70   : > { %2708 = vmatpush3.bf16.msra.mxu1 %v3137_v61  ;;  %2533 = vmatprep.subr.bf16.mxu0 %v3138_v63  ;;  %v1003_v63 = vld [vmem:[#allocation2 + $0x88] sm:$0xff] }
  0x71   : > { %2709 = vmatprep.subr.bf16.mxu1 %v3377_v39 }
  0x73   : > { %2534 = vmatpush3.bf16.msra.mxu0 %v3139_v1  ;;  %v1110_v1 = vld [vmem:[#allocation2 + $0x178] sm:$0xff] }
  0x74   : > { %2710 = vmatpush3.bf16.msra.mxu1 %v3140_v3  ;;  %2715 = vmatprep.subr.mxu0 %v3377_v39  ;;  %v1108_v3 = vld [vmem:[#allocation2 + $0x168] sm:$0xff] }
  0x75   : > { %2750 = vmatprep.subr.mxu1 %v3377_v39 }
  0x76   : > { %861 = vmatmul.mubr.bf16.vlgmr.msra.gmra.mxu0 %v292_v5  ;;  %v1106_v5 = vld [vmem:[#allocation2 + $0x158] sm:$0xff] }
  0x77   : > { %2712 = vmatmul.mubr.bf16.vlgmr.msra.gmra.mxu1 %v294_v6  ;;  %2747 = vmatprep.mubr.msk.f32.mxu0 %vm3378_vm0, %v3377_v39  ;;  %v1105_v6 = vld [vmem:[#allocation2 + $0x150] sm:$0xff] }
  0x78   : > { %2782 = vmatprep.mubr.msk.f32.mxu1 %vm3378_vm0, %v3377_v39  ;;  %2716 = vmatpush3.msra.mxu0 %v924_v7  ;;  %v1104_v7 = vld [vmem:[#allocation2 + $0x148] sm:$0xff] }
  0x79   : > { %2717 = vmatprep.subr.mxu0 %v3377_v39  ;;  %2751 = vmatpush3.msra.mxu1 %v1017_v23  ;;  %v1202_v23 = vld [vmem:[#allocation2 + $0x1f0] sm:$0xff] }
  0x7a   : > { %2718 = vmatpush3.msra.mxu0 %v923_v8  ;;  %2752 = vmatprep.subr.mxu1 %v3377_v39  ;;  %v1103_v8 = vld [vmem:[#allocation2 + $0x140] sm:$0xff] }
  0x7b   : > { %2719 = vmatprep.subr.mxu0 %v3377_v39  ;;  %2753 = vmatpush3.msra.mxu1 %v1016_v24  ;;  %v1201_v24 = vld [vmem:[#allocation2 + $0x1e8] sm:$0xff] }
  0x7c   : > { %2720 = vmatpush3.msra.mxu0 %v922_v9  ;;  %2754 = vmatprep.subr.mxu1 %v3377_v39  ;;  %v1102_v9 = vld [vmem:[#allocation2 + $0x138] sm:$0xff] }
  0x7d   : > { %2721 = vmatprep.subr.mxu0 %v3377_v39  ;;  %2755 = vmatpush3.msra.mxu1 %v1015_v25  ;;  %v1200_v25 = vld [vmem:[#allocation2 + $0x1e0] sm:$0xff] }
  0x7e   : > { %2722 = vmatpush3.msra.mxu0 %v921_v10  ;;  %2756 = vmatprep.subr.mxu1 %v3377_v39  ;;  %v1101_v10 = vld [vmem:[#allocation2 + $0x130] sm:$0xff] }
  0x7f   : > { %2723 = vmatprep.subr.mxu0 %v3377_v39  ;;  %2757 = vmatpush3.msra.mxu1 %v1014_v26  ;;  %v1199_v26 = vld [vmem:[#allocation2 + $0x1d8] sm:$0xff] }
  0x80   : > { %2724 = vmatpush3.msra.mxu0 %v920_v11  ;;  %2758 = vmatprep.subr.mxu1 %v3377_v39  ;;  %v1100_v11 = vld [vmem:[#allocation2 + $0x128] sm:$0xff] }
  0x81   : > { %2725 = vmatprep.subr.mxu0 %v3377_v39  ;;  %2759 = vmatpush3.msra.mxu1 %v1013_v27  ;;  %v1198_v27 = vld [vmem:[#allocation2 + $0x1d0] sm:$0xff] }
  0x82   : > { %2726 = vmatpush3.msra.mxu0 %v919_v12  ;;  %2760 = vmatprep.subr.mxu1 %v3377_v39  ;;  %v1099_v12 = vld [vmem:[#allocation2 + $0x120] sm:$0xff] }
  0x83   : > { %2727 = vmatprep.subr.mxu0 %v3377_v39  ;;  %2761 = vmatpush3.msra.mxu1 %v1012_v28  ;;  %v1197_v28 = vld [vmem:[#allocation2 + $0x1c8] sm:$0xff] }
  0x84   : > { %2728 = vmatpush3.msra.mxu0 %v918_v13  ;;  %2762 = vmatprep.subr.mxu1 %v3377_v39  ;;  %v1098_v13 = vld [vmem:[#allocation2 + $0x118] sm:$0xff] }
  0x85   : > { %2729 = vmatprep.subr.mxu0 %v3377_v39  ;;  %2763 = vmatpush3.msra.mxu1 %v1011_v29  ;;  %v1196_v29 = vld [vmem:[#allocation2 + $0x1c0] sm:$0xff] }
  0x86   : > { %2730 = vmatpush3.msra.mxu0 %v917_v14  ;;  %2764 = vmatprep.subr.mxu1 %v3377_v39  ;;  %v2408_v14 = vld [vmem:[%s3945_s4 + $0x1] ss:$0 sm:$0xff] }
  0x87   : > { %2731 = vmatprep.subr.mxu0 %v3377_v39  ;;  %2765 = vmatpush3.msra.mxu1 %v1010_v30  ;;  %v1195_v30 = vld [vmem:[#allocation2 + $0x1b8] sm:$0xff] }
  0x88   : > { %2732 = vmatpush3.msra.mxu0 %v916_v15  ;;  %2766 = vmatprep.subr.mxu1 %v3377_v39 }
  0x89   : > { %2733 = vmatprep.subr.mxu0 %v3377_v39  ;;  %2767 = vmatpush3.msra.mxu1 %v1009_v31  ;;  %v1194_v31 = vld [vmem:[#allocation2 + $0x1b0] sm:$0xff] }
  0x8a   : > { %2734 = vmatpush3.msra.mxu0 %v915_v16  ;;  %2768 = vmatprep.subr.mxu1 %v3377_v39 }
  0x8b   : > { %2735 = vmatprep.subr.mxu0 %v3377_v39  ;;  %2769 = vmatpush3.msra.mxu1 %v1008_v32  ;;  %v1193_v32 = vld [vmem:[#allocation2 + $0x1a8] sm:$0xff] }
  0x8c   : > { %2736 = vmatpush3.msra.mxu0 %v914_v17  ;;  %2770 = vmatprep.subr.mxu1 %v3377_v39 }
  0x8d   : > { %2737 = vmatprep.subr.mxu0 %v3377_v39  ;;  %2771 = vmatpush3.msra.mxu1 %v1007_v33  ;;  %v1192_v33 = vld [vmem:[#allocation2 + $0x1a0] sm:$0xff] }
  0x8e   : > { %2738 = vmatpush3.msra.mxu0 %v913_v18  ;;  %2772 = vmatprep.subr.mxu1 %v3377_v39 }
  0x8f   : > { %2739 = vmatprep.subr.mxu0 %v3377_v39  ;;  %2773 = vmatpush3.msra.mxu1 %v1006_v34  ;;  %v1191_v34 = vld [vmem:[#allocation2 + $0x198] sm:$0xff] }
  0x90   : > { %2740 = vmatpush3.msra.mxu0 %v912_v19  ;;  %2774 = vmatprep.subr.mxu1 %v3377_v39  ;;  %v1097_v19 = vld [vmem:[#allocation2 + $0x110] sm:$0xff] }
  0x91   : > { %2741 = vmatprep.subr.mxu0 %v3377_v39  ;;  %2775 = vmatpush3.msra.mxu1 %v1005_v35  ;;  %v2409_v35 = vld [vmem:[%s3945_s4 + $0x2] ss:$0 sm:$0xff] }
  0x92   : > { %2742 = vmatpush3.msra.mxu0 %v911_v20  ;;  %2776 = vmatprep.subr.mxu1 %v3377_v39  ;;  %v1096_v20 = vld [vmem:[#allocation2 + $0x108] sm:$0xff] }
  0x93   : > { %2743 = vmatprep.subr.mxu0 %v3377_v39  ;;  %2777 = vmatpush3.msra.mxu1 %v1004_v62 }
  0x94   : > { %2744 = vmatpush3.msra.mxu0 %v910_v21  ;;  %2778 = vmatprep.subr.mxu1 %v3377_v39  ;;  %v1095_v21 = vld [vmem:[#allocation2 + $0x100] sm:$0xff] }
  0x95   : > { %2745 = vmatprep.subr.mxu0 %v3377_v39  ;;  %2779 = vmatpush3.msra.mxu1 %v1003_v63  ;;  %v1281_v63 = vld [vmem:[#allocation2 + $0x208] sm:$0xff] }
  0x96   : > { %2746 = vmatpush3.msra.mxu0 %v909_v22  ;;  %2780 = vmatprep.subr.mxu1 %v3377_v39  ;;  %v1203_v22 = vld [vmem:[#allocation2 + $0x1f8] sm:$0xff] }
  0x97   : > { %2785 = vmatprep.subr.mxu0 %v3377_v39  ;;  %2781 = vmatpush3.msra.mxu1 %v1002_v0  ;;  %v1280_v0 = vld [vmem:[#allocation2 + $0x200] sm:$0xff] }
  0x98   : > { %2820 = vmatprep.subr.mxu1 %v3377_v39 }
 0x116   : > { %v2491_v36 = vpop.f32.mrf.mxu0 }
 0x117   : > { %v2513_v37 = vpop.f32.mrf.mxu1 }
 0x118   : > { %v2492_v38 = vpop.f32.mrf.mxu0 }
 0x119   : > { %v2514_v40 = vpop.f32.mrf.mxu1  ;;  %v2493_v45 = vadd.f32 %v2492_v38, %v2491_v36 }
 0x11a   : > { %v2494_v41 = vpop.f32.mrf.mxu0  ;;  %v2515_v48 = vadd.f32 %v2514_v40, %v2513_v37 }
 0x11b   : > { %v2516_v42 = vpop.f32.mrf.mxu1  ;;  %v783_v47 = vadd.f32 %v2493_v45, %v2351_v46  ;;  %v1190_v41 = vld [vmem:[#allocation2 + $0x190] sm:$0xff]  ;;  %v1293_v46 = vld [vmem:[#allocation2 + $0x268] sm:$0xff] }
 0x11c   : > { %v2495_v43 = vpop.f32.mrf.mxu0  ;;  %v1189_v42 = vld [vmem:[#allocation2 + $0x188] sm:$0xff]  ;;  %v1294_v45 = vld [vmem:[#allocation2 + $0x270] sm:$0xff] }
 0x11d   : > { %v2517_v44 = vpop.f32.mrf.mxu1  ;;  %v823_v52 = vadd.f32 %v2515_v48, %v783_v47  ;;  %v1188_v43 = vld [vmem:[#allocation2 + $0x180] sm:$0xff]  ;;  %v1291_v48 = vld [vmem:[#allocation2 + $0x258] sm:$0xff] }
 0x11e   : > { %v1295_v44 = vld [vmem:[#allocation2 + $0x278] sm:$0xff]  ;;  %v1292_v47 = vld [vmem:[#allocation2 + $0x260] sm:$0xff] }
 0x136   : > { %v2535_v49 = vpop.f32.mrf.mxu0 }
 0x137   : > { %v902_v50 = vpop.f32.mrf.mxu1 }
 0x138   : > { %v2536_v51 = vpop.f32.mrf.mxu0 }
 0x139   : > { %v2537_v53 = vadd.f32 %v2536_v51, %v2535_v49  ;;  %v2713_v54 = vpop.f32.mrf.mxu1  ;;  %v1290_v49 = vld [vmem:[#allocation2 + $0x250] sm:$0xff]  ;;  %v1288_v51 = vld [vmem:[#allocation2 + $0x240] sm:$0xff] }
 0x13a   : > { %v2538_v55 = vpop.f32.mrf.mxu0  ;;  %v1285_v54 = vld [vmem:[#allocation2 + $0x228] sm:$0xff] }
 0x13b   : > { %v863_v56 = vadd.f32 %v2537_v53, %v823_v52  ;;  %v905_v57 = vpop.f32.mrf.mxu1  ;;  %v1287_v52 = vld [vmem:[#allocation2 + $0x238] sm:$0xff]  ;;  %v1286_v53 = vld [vmem:[#allocation2 + $0x230] sm:$0xff]  ;;  %v1284_v55 = vld [vmem:[#allocation2 + $0x220] sm:$0xff] }
 0x13c   : > { %v2539_v58 = vpop.f32.mrf.mxu0  ;;  %v1282_v57 = vld [vmem:[#allocation2 + $0x210] sm:$0xff] }
 0x13d   : > { %v903_v59 = vadd.f32 %v902_v50, %v863_v56  ;;  %v2714_v60 = vpop.f32.mrf.mxu1  ;;  %v1289_v50 = vld [vmem:[#allocation2 + $0x248] sm:$0xff]  ;;  %v1283_v56 = vld [vmem:[#allocation2 + $0x218] sm:$0xff]  ;;  %v2410_v58 = vld [vmem:[%s3945_s4 + $0x3] ss:$0 sm:$0xff] }
 0x13f   : > { %v908_v61 = vmax.f32 %v903_v59, 0.0 }
 0x141   : > { %2748 = vmatmul.mubr.f32.vlgmr.msra.gmra.mxu0 %v908_v61 }
 0x142   : > { %2817 = vmatprep.mubr.msk.f32.mxu0 %vm3378_vm0, %v3377_v39  ;;  %2786 = vmatpush3.msra.mxu0 %v1110_v1  ;;  %v1388_v1 = vld [vmem:[#allocation2 + $0x2f8] sm:$0xff] }
 0x143   : > { %2787 = vmatprep.subr.mxu0 %v3377_v39 }
 0x144   : > { %2788 = vmatpush3.msra.mxu0 %v1109_v2  ;;  %v1387_v2 = vld [vmem:[#allocation2 + $0x2f0] sm:$0xff] }
 0x145   : > { %2789 = vmatprep.subr.mxu0 %v3377_v39 }
 0x146   : > { %2790 = vmatpush3.msra.mxu0 %v1108_v3  ;;  %v1386_v3 = vld [vmem:[#allocation2 + $0x2e8] sm:$0xff] }
 0x147   : > { %2791 = vmatprep.subr.mxu0 %v3377_v39 }
 0x148   : > { %2792 = vmatpush3.msra.mxu0 %v1107_v4  ;;  %v1385_v4 = vld [vmem:[#allocation2 + $0x2e0] sm:$0xff] }
 0x149   : > { %2793 = vmatprep.subr.mxu0 %v3377_v39 }
 0x14a   : > { %2794 = vmatpush3.msra.mxu0 %v1106_v5  ;;  %v1384_v5 = vld [vmem:[#allocation2 + $0x2d8] sm:$0xff] }
 0x14b   : > { %2795 = vmatprep.subr.mxu0 %v3377_v39 }
 0x14c   : > { %2796 = vmatpush3.msra.mxu0 %v1105_v6  ;;  %v1383_v6 = vld [vmem:[#allocation2 + $0x2d0] sm:$0xff] }
 0x14d   : > { %2797 = vmatprep.subr.mxu0 %v3377_v39 }
 0x14e   : > { %2798 = vmatpush3.msra.mxu0 %v1104_v7  ;;  %v1382_v7 = vld [vmem:[#allocation2 + $0x2c8] sm:$0xff] }
 0x14f   : > { %2799 = vmatprep.subr.mxu0 %v3377_v39 }
 0x150   : > { %2800 = vmatpush3.msra.mxu0 %v1103_v8  ;;  %v1381_v8 = vld [vmem:[#allocation2 + $0x2c0] sm:$0xff] }
 0x151   : > { %2801 = vmatprep.subr.mxu0 %v3377_v39 }
 0x152   : > { %2802 = vmatpush3.msra.mxu0 %v1102_v9  ;;  %v1380_v9 = vld [vmem:[#allocation2 + $0x2b8] sm:$0xff] }
 0x153   : > { %2803 = vmatprep.subr.mxu0 %v3377_v39 }
 0x154   : > { %2804 = vmatpush3.msra.mxu0 %v1101_v10  ;;  %v1379_v10 = vld [vmem:[#allocation2 + $0x2b0] sm:$0xff] }
 0x155   : > { %2805 = vmatprep.subr.mxu0 %v3377_v39 }
 0x156   : > { %2806 = vmatpush3.msra.mxu0 %v1100_v11  ;;  %v1378_v11 = vld [vmem:[#allocation2 + $0x2a8] sm:$0xff] }
 0x157   : > { %2807 = vmatprep.subr.mxu0 %v3377_v39 }
 0x158   : > { %2808 = vmatpush3.msra.mxu0 %v1099_v12  ;;  %v1377_v12 = vld [vmem:[#allocation2 + $0x2a0] sm:$0xff] }
 0x159   : > { %2809 = vmatprep.subr.mxu0 %v3377_v39 }
 0x15a   : > { %2810 = vmatpush3.msra.mxu0 %v1098_v13  ;;  %v1376_v13 = vld [vmem:[#allocation2 + $0x298] sm:$0xff] }
 0x15b   : > { %2811 = vmatprep.subr.mxu0 %v3377_v39 }
 0x15c   : > { %2812 = vmatpush3.msra.mxu0 %v1097_v19  ;;  %v1374_v19 = vld [vmem:[#allocation2 + $0x288] sm:$0xff] }
 0x15d   : > { %2813 = vmatprep.subr.mxu0 %v3377_v39 }
 0x15e   : > { %2814 = vmatpush3.msra.mxu0 %v1096_v20  ;;  %v1373_v20 = vld [vmem:[#allocation2 + $0x280] sm:$0xff] }
 0x15f   : > { %2815 = vmatprep.subr.mxu0 %v3377_v39 }
 0x160   : > { %2816 = vmatpush3.msra.mxu0 %v1095_v21  ;;  %v1481_v21 = vld [vmem:[#allocation2 + $0x378] sm:$0xff] }
 0x161   : > { %2855 = vmatprep.subr.mxu0 %v3377_v39 }
 0x201   : > { %v996_v15 = vpop.f32.mrf.mxu0 }
 0x202   : > { %v997_v16 = vadd.f32 %v2408_v14, %v996_v15  ;;  %v2411_v14 = vld [vmem:[%s3945_s4 + $0x4] ss:$0 sm:$0xff] }
 0x203   : > { %v2749_v17 = vpop.f32.mrf.mxu0 }
 0x204   : > { %v1000_v18 = vmax.f32 %v997_v16, 0.0 }
 0x206   : > { %2783 = vmatmul.mubr.f32.vlgmr.msra.gmra.mxu1 %v1000_v18  ;;  %v1375_v18 = vld [vmem:[#allocation2 + $0x290] sm:$0xff] }
 0x207   : > { %2852 = vmatprep.mubr.msk.f32.mxu1 %vm3378_vm0, %v3377_v39  ;;  %2821 = vmatpush3.msra.mxu1 %v1203_v22  ;;  %v1480_v22 = vld [vmem:[#allocation2 + $0x370] sm:$0xff] }
 0x208   : > { %2822 = vmatprep.subr.mxu1 %v3377_v39 }
 0x209   : > { %2823 = vmatpush3.msra.mxu1 %v1202_v23  ;;  %v1479_v23 = vld [vmem:[#allocation2 + $0x368] sm:$0xff] }
 0x20a   : > { %2824 = vmatprep.subr.mxu1 %v3377_v39 }
 0x20b   : > { %2825 = vmatpush3.msra.mxu1 %v1201_v24  ;;  %v1478_v24 = vld [vmem:[#allocation2 + $0x360] sm:$0xff] }
 0x20c   : > { %2826 = vmatprep.subr.mxu1 %v3377_v39 }
 0x20d   : > { %2827 = vmatpush3.msra.mxu1 %v1200_v25  ;;  %v1477_v25 = vld [vmem:[#allocation2 + $0x358] sm:$0xff] }
 0x20e   : > { %2828 = vmatprep.subr.mxu1 %v3377_v39 }
 0x20f   : > { %2829 = vmatpush3.msra.mxu1 %v1199_v26  ;;  %v1476_v26 = vld [vmem:[#allocation2 + $0x350] sm:$0xff] }
 0x210   : > { %2830 = vmatprep.subr.mxu1 %v3377_v39 }
 0x211   : > { %2831 = vmatpush3.msra.mxu1 %v1198_v27  ;;  %v1475_v27 = vld [vmem:[#allocation2 + $0x348] sm:$0xff] }
 0x212   : > { %2832 = vmatprep.subr.mxu1 %v3377_v39 }
 0x213   : > { %2833 = vmatpush3.msra.mxu1 %v1197_v28  ;;  %v1474_v28 = vld [vmem:[#allocation2 + $0x340] sm:$0xff] }
 0x214   : > { %2834 = vmatprep.subr.mxu1 %v3377_v39 }
 0x215   : > { %2835 = vmatpush3.msra.mxu1 %v1196_v29  ;;  %v1473_v29 = vld [vmem:[#allocation2 + $0x338] sm:$0xff] }
 0x216   : > { %2836 = vmatprep.subr.mxu1 %v3377_v39 }
 0x217   : > { %2837 = vmatpush3.msra.mxu1 %v1195_v30  ;;  %v1472_v30 = vld [vmem:[#allocation2 + $0x330] sm:$0xff] }
 0x218   : > { %2838 = vmatprep.subr.mxu1 %v3377_v39 }
 0x219   : > { %2839 = vmatpush3.msra.mxu1 %v1194_v31  ;;  %v1471_v31 = vld [vmem:[#allocation2 + $0x328] sm:$0xff] }
 0x21a   : > { %2840 = vmatprep.subr.mxu1 %v3377_v39 }
 0x21b   : > { %2841 = vmatpush3.msra.mxu1 %v1193_v32  ;;  %v1470_v32 = vld [vmem:[#allocation2 + $0x320] sm:$0xff] }
 0x21c   : > { %2842 = vmatprep.subr.mxu1 %v3377_v39 }
 0x21d   : > { %2843 = vmatpush3.msra.mxu1 %v1192_v33  ;;  %v1469_v33 = vld [vmem:[#allocation2 + $0x318] sm:$0xff] }
 0x21e   : > { %2844 = vmatprep.subr.mxu1 %v3377_v39 }
 0x21f   : > { %2845 = vmatpush3.msra.mxu1 %v1191_v34  ;;  %v2412_v34 = vld [vmem:[%s3945_s4 + $0x5] ss:$0 sm:$0xff] }
 0x220   : > { %2846 = vmatprep.subr.mxu1 %v3377_v39 }
 0x221   : > { %2847 = vmatpush3.msra.mxu1 %v1190_v41  ;;  %v1467_v41 = vld [vmem:[#allocation2 + $0x308] sm:$0xff] }
 0x222   : > { %2848 = vmatprep.subr.mxu1 %v3377_v39 }
 0x223   : > { %2849 = vmatpush3.msra.mxu1 %v1189_v42  ;;  %v1466_v42 = vld [vmem:[#allocation2 + $0x300] sm:$0xff] }
 0x224   : > { %2850 = vmatprep.subr.mxu1 %v3377_v39 }
 0x225   : > { %2851 = vmatpush3.msra.mxu1 %v1188_v43  ;;  %v1574_v43 = vld [vmem:[#allocation2 + $0x3f8] sm:$0xff] }
 0x226   : > { %2890 = vmatprep.subr.mxu1 %v3377_v39 }
 0x2c6   : > { %v1089_v36 = vpop.f32.mrf.mxu1 }
 0x2c7   : > { %v1090_v37 = vadd.f32 %v2409_v35, %v1089_v36 }
 0x2c8   : > { %v2784_v38 = vpop.f32.mrf.mxu1 }
 0x2c9   : > { %v1093_v40 = vmax.f32 %v1090_v37, 0.0 }
 0x2cb   : > { %2818 = vmatmul.mubr.f32.vlgmr.msra.gmra.mxu0 %v1093_v40  ;;  %v1468_v40 = vld [vmem:[#allocation2 + $0x310] sm:$0xff] }
 0x2cc   : > { %2887 = vmatprep.mubr.msk.f32.mxu0 %vm3378_vm0, %v3377_v39  ;;  %2856 = vmatpush3.msra.mxu0 %v1295_v44  ;;  %v1573_v44 = vld [vmem:[#allocation2 + $0x3f0] sm:$0xff] }
 0x2cd   : > { %2857 = vmatprep.subr.mxu0 %v3377_v39 }
 0x2ce   : > { %2858 = vmatpush3.msra.mxu0 %v1294_v45  ;;  %v1572_v45 = vld [vmem:[#allocation2 + $0x3e8] sm:$0xff] }
 0x2cf   : > { %2859 = vmatprep.subr.mxu0 %v3377_v39 }
 0x2d0   : > { %2860 = vmatpush3.msra.mxu0 %v1293_v46  ;;  %v1571_v46 = vld [vmem:[#allocation2 + $0x3e0] sm:$0xff] }
 0x2d1   : > { %2861 = vmatprep.subr.mxu0 %v3377_v39 }
 0x2d2   : > { %2862 = vmatpush3.msra.mxu0 %v1292_v47  ;;  %v1570_v47 = vld [vmem:[#allocation2 + $0x3d8] sm:$0xff] }
 0x2d3   : > { %2863 = vmatprep.subr.mxu0 %v3377_v39 }
 0x2d4   : > { %2864 = vmatpush3.msra.mxu0 %v1291_v48  ;;  %v1569_v48 = vld [vmem:[#allocation2 + $0x3d0] sm:$0xff] }
 0x2d5   : > { %2865 = vmatprep.subr.mxu0 %v3377_v39 }
 0x2d6   : > { %2866 = vmatpush3.msra.mxu0 %v1290_v49  ;;  %v1568_v49 = vld [vmem:[#allocation2 + $0x3c8] sm:$0xff] }
 0x2d7   : > { %2867 = vmatprep.subr.mxu0 %v3377_v39 }
 0x2d8   : > { %2868 = vmatpush3.msra.mxu0 %v1289_v50  ;;  %v1567_v50 = vld [vmem:[#allocation2 + $0x3c0] sm:$0xff] }
 0x2d9   : > { %2869 = vmatprep.subr.mxu0 %v3377_v39 }
 0x2da   : > { %2870 = vmatpush3.msra.mxu0 %v1288_v51  ;;  %v1566_v51 = vld [vmem:[#allocation2 + $0x3b8] sm:$0xff] }
 0x2db   : > { %2871 = vmatprep.subr.mxu0 %v3377_v39 }
 0x2dc   : > { %2872 = vmatpush3.msra.mxu0 %v1287_v52  ;;  %v1565_v52 = vld [vmem:[#allocation2 + $0x3b0] sm:$0xff] }
 0x2dd   : > { %2873 = vmatprep.subr.mxu0 %v3377_v39 }
 0x2de   : > { %2874 = vmatpush3.msra.mxu0 %v1286_v53  ;;  %v1564_v53 = vld [vmem:[#allocation2 + $0x3a8] sm:$0xff] }
 0x2df   : > { %2875 = vmatprep.subr.mxu0 %v3377_v39 }
 0x2e0   : > { %2876 = vmatpush3.msra.mxu0 %v1285_v54  ;;  %v1563_v54 = vld [vmem:[#allocation2 + $0x3a0] sm:$0xff] }
 0x2e1   : > { %2877 = vmatprep.subr.mxu0 %v3377_v39 }
 0x2e2   : > { %2878 = vmatpush3.msra.mxu0 %v1284_v55  ;;  %v1562_v55 = vld [vmem:[#allocation2 + $0x398] sm:$0xff] }
 0x2e3   : > { %2879 = vmatprep.subr.mxu0 %v3377_v39 }
 0x2e4   : > { %2880 = vmatpush3.msra.mxu0 %v1283_v56  ;;  %v2413_v56 = vld [vmem:[%s3945_s4 + $0x6] ss:$0 sm:$0xff] }
 0x2e5   : > { %2881 = vmatprep.subr.mxu0 %v3377_v39 }
 0x2e6   : > { %2882 = vmatpush3.msra.mxu0 %v1282_v57 }
 0x2e7   : > { %2883 = vmatprep.subr.mxu0 %v3377_v39 }
 0x2e8   : > { %2884 = vmatpush3.msra.mxu0 %v1281_v63  ;;  %v1559_v63 = vld [vmem:[#allocation2 + $0x380] sm:$0xff] }
 0x2e9   : > { %2885 = vmatprep.subr.mxu0 %v3377_v39 }
 0x2ea   : > { %2886 = vmatpush3.msra.mxu0 %v1280_v0  ;;  %v3141_v0 = vld [vmem:[#allocation5 + $0x188] ss:$28 sps:$4 sm:$0xff]  }
 0x2eb   : > { %2925 = vmatprep.subr.mxu0 %v3377_v39 }
 0x38b   : > { %v1182_v59 = vpop.f32.mrf.mxu0 }
 0x38c   : > { %v1183_v60 = vadd.f32 %v2410_v58, %v1182_v59 }
 0x38d   : > { %v2819_v61 = vpop.f32.mrf.mxu0 }
 0x38e   : > { %v1186_v62 = vmax.f32 %v1183_v60, 0.0  ;;  %v1561_v61 = vld [vmem:[#allocation2 + $0x390] sm:$0xff] }
 0x390   : > { %2853 = vmatmul.mubr.f32.vlgmr.msra.gmra.mxu1 %v1186_v62  ;;  %v1560_v62 = vld [vmem:[#allocation2 + $0x388] sm:$0xff] }
 0x391   : > { %2922 = vmatprep.mubr.msk.f32.mxu1 %vm3378_vm0, %v3377_v39  ;;  %2891 = vmatpush3.msra.mxu1 %v1388_v1  ;;  %v3143_v1 = vld [vmem:[#allocation5 + $0x18c] ss:$28 sps:$4 sm:$0xff]  }
 0x392   : > { %2892 = vmatprep.subr.mxu1 %v3377_v39 }
 0x393   : > { %2893 = vmatpush3.msra.mxu1 %v1387_v2  ;;  %v3146_v2 = vld [vmem:[#allocation5 + $0x194] ss:$28 sps:$4 sm:$0xff]  }
 0x394   : > { %2894 = vmatprep.subr.mxu1 %v3377_v39 }
 0x395   : > { %2895 = vmatpush3.msra.mxu1 %v1386_v3  ;;  %v3149_v3 = vld [vmem:[#allocation5 + $0x154] ss:$28 sps:$4 sm:$0xff]  }
 0x396   : > { %2896 = vmatprep.subr.mxu1 %v3377_v39 }
 0x397   : > { %2897 = vmatpush3.msra.mxu1 %v1385_v4  ;;  %v3147_v4 = vld [vmem:[#allocation5 + $0x150] ss:$28 sps:$4 sm:$0xff]  }
 0x398   : > { %2898 = vmatprep.subr.mxu1 %v3377_v39 }
 0x399   : > { %2899 = vmatpush3.msra.mxu1 %v1384_v5  ;;  %v3155_v5 = vld [vmem:[#allocation5 + $0x11c] ss:$28 sps:$4 sm:$0xff]  }
 0x39a   : > { %2900 = vmatprep.subr.mxu1 %v3377_v39 }
 0x39b   : > { %2901 = vmatpush3.msra.mxu1 %v1383_v6  ;;  %v3153_v6 = vld [vmem:[#allocation5 + $0x118] ss:$28 sps:$4 sm:$0xff]  }
 0x39c   : > { %2902 = vmatprep.subr.mxu1 %v3377_v39 }
 0x39d   : > { %2903 = vmatpush3.msra.mxu1 %v1382_v7  ;;  %v3161_v7 = vld [vmem:[#allocation5 + $0xe4] ss:$28 sps:$4 sm:$0xff]  }
 0x39e   : > { %2904 = vmatprep.subr.mxu1 %v3377_v39 }
 0x39f   : > { %2905 = vmatpush3.msra.mxu1 %v1381_v8  ;;  %v3159_v8 = vld [vmem:[#allocation5 + $0xe0] ss:$28 sps:$4 sm:$0xff]  }
 0x3a0   : > { %2906 = vmatprep.subr.mxu1 %v3377_v39 }
 0x3a1   : > { %2907 = vmatpush3.msra.mxu1 %v1380_v9  ;;  %v3167_v9 = vld [vmem:[#allocation5 + $0xac] ss:$28 sps:$4 sm:$0xff]  }
 0x3a2   : > { %2908 = vmatprep.subr.mxu1 %v3377_v39 }
 0x3a3   : > { %2909 = vmatpush3.msra.mxu1 %v1379_v10  ;;  %v3165_v10 = vld [vmem:[#allocation5 + $0xa8] ss:$28 sps:$4 sm:$0xff]  }
 0x3a4   : > { %2910 = vmatprep.subr.mxu1 %v3377_v39 }
 0x3a5   : > { %2911 = vmatpush3.msra.mxu1 %v1378_v11  ;;  %v3173_v11 = vld [vmem:[#allocation5 + $0x74] ss:$28 sps:$4 sm:$0xff]  }
 0x3a6   : > { %2912 = vmatprep.subr.mxu1 %v3377_v39 }
 0x3a7   : > { %2913 = vmatpush3.msra.mxu1 %v1377_v12  ;;  %v3171_v12 = vld [vmem:[#allocation5 + $0x70] ss:$28 sps:$4 sm:$0xff]  }
 0x3a8   : > { %2914 = vmatprep.subr.mxu1 %v3377_v39 }
 0x3a9   : > { %2915 = vmatpush3.msra.mxu1 %v1376_v13  ;;  %v3179_v13 = vld [vmem:[#allocation5 + $0x3c] ss:$28 sps:$4 sm:$0xff]  }
 0x3aa   : > { %2916 = vmatprep.subr.mxu1 %v3377_v39 }
 0x3ab   : > { %2917 = vmatpush3.msra.mxu1 %v1375_v18 }
 0x3ac   : > { %2918 = vmatprep.subr.mxu1 %v3377_v39 }
 0x3ad   : > { %2919 = vmatpush3.msra.mxu1 %v1374_v19  ;;  %v3144_v19 = vld [vmem:[#allocation5 + $0x190] ss:$28 sps:$4 sm:$0xff]  }
 0x3ae   : > { %2920 = vmatprep.subr.mxu1 %v3377_v39 }
 0x3af   : > { %2921 = vmatpush3.msra.mxu1 %v1373_v20 }
 0x3b0   : > { %2960 = vmatprep.subr.mxu1 %v3377_v39 }
 0x450   : > { %v1275_v15 = vpop.f32.mrf.mxu1 }
 0x451   : > { %v1276_v16 = vadd.f32 %v2411_v14, %v1275_v15  ;;  %v3177_v14 = vld [vmem:[#allocation5 + $0x38] ss:$28 sps:$4 sm:$0xff]   ;;  %v2414_v15 = vld [vmem:[%s3945_s4 + $0x7] ss:$0 sm:$0xff] }
 0x452   : > { %v2854_v17 = vpop.f32.mrf.mxu1 }
 0x453   : > { %2888 = vmatmul.mubr.f32.vlgmr.msra.gmra.mxu0 %v1276_v16 }
 0x454   : > { %2957 = vmatprep.mubr.msk.f32.mxu0 %vm3378_vm0, %v3377_v39  ;;  %2926 = vmatpush3.msra.mxu0 %v1481_v21  ;;  %v3152_v21 = vld [vmem:[#allocation5 + $0x15c] ss:$28 sps:$4 sm:$0xff]  }
 0x455   : > { %2927 = vmatprep.subr.mxu0 %v3377_v39 }
 0x456   : > { %2928 = vmatpush3.msra.mxu0 %v1480_v22  ;;  %v3150_v22 = vld [vmem:[#allocation5 + $0x158] ss:$28 sps:$4 sm:$0xff]  }
 0x457   : > { %2929 = vmatprep.subr.mxu0 %v3377_v39 }
 0x458   : > { %2930 = vmatpush3.msra.mxu0 %v1479_v23  ;;  %v3158_v23 = vld [vmem:[#allocation5 + $0x124] ss:$28 sps:$4 sm:$0xff]  }
 0x459   : > { %2931 = vmatprep.subr.mxu0 %v3377_v39 }
 0x45a   : > { %2932 = vmatpush3.msra.mxu0 %v1478_v24  ;;  %v3156_v24 = vld [vmem:[#allocation5 + $0x120] ss:$28 sps:$4 sm:$0xff]  }
 0x45b   : > { %2933 = vmatprep.subr.mxu0 %v3377_v39 }
 0x45c   : > { %2934 = vmatpush3.msra.mxu0 %v1477_v25  ;;  %v3164_v25 = vld [vmem:[#allocation5 + $0xec] ss:$28 sps:$4 sm:$0xff]  }
 0x45d   : > { %2935 = vmatprep.subr.mxu0 %v3377_v39 }
 0x45e   : > { %2936 = vmatpush3.msra.mxu0 %v1476_v26  ;;  %v3162_v26 = vld [vmem:[#allocation5 + $0xe8] ss:$28 sps:$4 sm:$0xff]  }
 0x45f   : > { %2937 = vmatprep.subr.mxu0 %v3377_v39 }
 0x460   : > { %2938 = vmatpush3.msra.mxu0 %v1475_v27  ;;  %v3170_v27 = vld [vmem:[#allocation5 + $0xb4] ss:$28 sps:$4 sm:$0xff]  }
 0x461   : > { %2939 = vmatprep.subr.mxu0 %v3377_v39 }
 0x462   : > { %2940 = vmatpush3.msra.mxu0 %v1474_v28  ;;  %v3168_v28 = vld [vmem:[#allocation5 + $0xb0] ss:$28 sps:$4 sm:$0xff]  }
 0x463   : > { %2941 = vmatprep.subr.mxu0 %v3377_v39 }
 0x464   : > { %2942 = vmatpush3.msra.mxu0 %v1473_v29  ;;  %v3176_v29 = vld [vmem:[#allocation5 + $0x7c] ss:$28 sps:$4 sm:$0xff]  }
 0x465   : > { %2943 = vmatprep.subr.mxu0 %v3377_v39 }
 0x466   : > { %2944 = vmatpush3.msra.mxu0 %v1472_v30  ;;  %v3174_v30 = vld [vmem:[#allocation5 + $0x78] ss:$28 sps:$4 sm:$0xff]  }
 0x467   : > { %2945 = vmatprep.subr.mxu0 %v3377_v39 }
 0x468   : > { %2946 = vmatpush3.msra.mxu0 %v1471_v31  ;;  %v3182_v31 = vld [vmem:[#allocation5 + $0x44] ss:$28 sps:$4 sm:$0xff]  }
 0x469   : > { %2947 = vmatprep.subr.mxu0 %v3377_v39 }
 0x46a   : > { %2948 = vmatpush3.msra.mxu0 %v1470_v32  ;;  %v3180_v32 = vld [vmem:[#allocation5 + $0x40] ss:$28 sps:$4 sm:$0xff]  }
 0x46b   : > { %2949 = vmatprep.subr.mxu0 %v3377_v39 }
 0x46c   : > { %2950 = vmatpush3.msra.mxu0 %v1469_v33  ;;  %v3185_v33 = vld [vmem:[#allocation5 + $0x4] ss:$28 sps:$4 sm:$0xff]  }
 0x46d   : > { %2951 = vmatprep.subr.mxu0 %v3377_v39 }
 0x46e   : > { %2952 = vmatpush3.msra.mxu0 %v1468_v40  ;;  %v2415_v40 = vld [vmem:[%s3945_s4 + $0x8] ss:$0 sm:$0xff] }
 0x46f   : > { %2953 = vmatprep.subr.mxu0 %v3377_v39 }
 0x470   : > { %2954 = vmatpush3.msra.mxu0 %v1467_v41 }
 0x471   : > { %2955 = vmatprep.subr.mxu0 %v3377_v39 }
 0x472   : > { %2956 = vmatpush3.msra.mxu0 %v1466_v42 }
 0x473   : > { %2041 = vmatprep.subr.bf16.mxu0 %v3143_v1  ;;  %v3216_v1 = vld [vmem:[#allocation5 + $0x50] ss:$28 sps:$4 sm:$0xff]  }
 0x513   : > { %v1367_v35 = vpop.f32.mrf.mxu0 }
 0x514   : > { %v1368_v36 = vadd.f32 %v2412_v34, %v1367_v35  ;;  %v3188_v34 = vld [vmem:[#allocation5 + $0xc] ss:$28 sps:$4 sm:$0xff]   ;;  %v3183_v35 = vld [vmem:[#allocation5] ss:$28 sps:$4 sm:$0xff]  }
 0x515   : > { %v2889_v37 = vpop.f32.mrf.mxu0 }
 0x516   : > { %v1371_v38 = vmax.f32 %v1368_v36, 0.0  ;;  %v3186_v36 = vld [vmem:[#allocation5 + $0x8] ss:$28 sps:$4 sm:$0xff]   ;;  %v3191_v37 = vld [vmem:[#allocation5 + $0x19c] ss:$28 sps:$4 sm:$0xff]  }
 0x518   : > { %2923 = vmatmul.mubr.f32.vlgmr.msra.gmra.mxu1 %v1371_v38  ;;  %v3379_v38 = vmov 0  }
 0x519   : > { %2992 = vmatprep.mubr.msk.f32.mxu1 %vm3378_vm0, %v3377_v39  ;;  %2961 = vmatpush3.msra.mxu1 %v1574_v43 }
 0x51a   : > { %2962 = vmatprep.subr.mxu1 %v3377_v39 }
 0x51b   : > { %2963 = vmatpush3.msra.mxu1 %v1573_v44 }
 0x51c   : > { %2964 = vmatprep.subr.mxu1 %v3377_v39 }
 0x51d   : > { %2965 = vmatpush3.msra.mxu1 %v1572_v45  ;;  %v3189_v45 = vld [vmem:[#allocation5 + $0x198] ss:$28 sps:$4 sm:$0xff]  }
 0x51e   : > { %2966 = vmatprep.subr.mxu1 %v3377_v39 }
 0x51f   : > { %2967 = vmatpush3.msra.mxu1 %v1571_v46  ;;  %v3192_v46 = vld [vmem:[#allocation5 + $0x1a0] ss:$28 sps:$4 sm:$0xff]  }
 0x520   : > { %2968 = vmatprep.subr.mxu1 %v3377_v39 }
 0x521   : > { %2969 = vmatpush3.msra.mxu1 %v1570_v47 }
 0x522   : > { %2970 = vmatprep.subr.mxu1 %v3377_v39 }
 0x523   : > { %2971 = vmatpush3.msra.mxu1 %v1569_v48  ;;  %v3195_v48 = vld [vmem:[#allocation5 + $0x164] ss:$28 sps:$4 sm:$0xff]  }
 0x524   : > { %2972 = vmatprep.subr.mxu1 %v3377_v39 }
 0x525   : > { %2973 = vmatpush3.msra.mxu1 %v1568_v49  ;;  %v3193_v49 = vld [vmem:[#allocation5 + $0x160] ss:$28 sps:$4 sm:$0xff]  }
 0x526   : > { %2974 = vmatprep.subr.mxu1 %v3377_v39 }
 0x527   : > { %2975 = vmatpush3.msra.mxu1 %v1567_v50  ;;  %v3196_v50 = vld [vmem:[#allocation5 + $0x168] ss:$28 sps:$4 sm:$0xff]  }
 0x528   : > { %2976 = vmatprep.subr.mxu1 %v3377_v39 }
 0x529   : > { %2977 = vmatpush3.msra.mxu1 %v1566_v51  ;;  %v3199_v51 = vld [vmem:[#allocation5 + $0x12c] ss:$28 sps:$4 sm:$0xff]  }
 0x52a   : > { %2978 = vmatprep.subr.mxu1 %v3377_v39 }
 0x52b   : > { %2979 = vmatpush3.msra.mxu1 %v1565_v52  ;;  %v3197_v52 = vld [vmem:[#allocation5 + $0x128] ss:$28 sps:$4 sm:$0xff]  }
 0x52c   : > { %2980 = vmatprep.subr.mxu1 %v3377_v39 }
 0x52d   : > { %2981 = vmatpush3.msra.mxu1 %v1564_v53  ;;  %v3200_v53 = vld [vmem:[#allocation5 + $0x130] ss:$28 sps:$4 sm:$0xff]  }
 0x52e   : > { %2982 = vmatprep.subr.mxu1 %v3377_v39 }
 0x52f   : > { %2983 = vmatpush3.msra.mxu1 %v1563_v54  ;;  %v3203_v54 = vld [vmem:[#allocation5 + $0xf4] ss:$28 sps:$4 sm:$0xff]  }
 0x530   : > { %2984 = vmatprep.subr.mxu1 %v3377_v39 }
 0x531   : > { %2985 = vmatpush3.msra.mxu1 %v1562_v55  ;;  %v3201_v55 = vld [vmem:[#allocation5 + $0xf0] ss:$28 sps:$4 sm:$0xff]  }
 0x532   : > { %2986 = vmatprep.subr.mxu1 %v3377_v39 }
 0x533   : > { %2987 = vmatpush3.msra.mxu1 %v1561_v61  ;;  %v3209_v61 = vld [vmem:[#allocation5 + $0x80] ss:$28 sps:$4 sm:$0xff]  }
 0x534   : > { %2988 = vmatprep.subr.mxu1 %v3377_v39 }
 0x535   : > { %2989 = vmatpush3.msra.mxu1 %v1560_v62  ;;  %v3212_v62 = vld [vmem:[#allocation5 + $0x88] ss:$28 sps:$4 sm:$0xff]  }
 0x536   : > { %2990 = vmatprep.subr.mxu1 %v3377_v39 }
 0x537   : > { %2991 = vmatpush3.msra.mxu1 %v1559_v63  ;;  %v3215_v63 = vld [vmem:[#allocation5 + $0x4c] ss:$28 sps:$4 sm:$0xff]  }
 0x538   : > { %2082 = vmatprep.subr.bf16.mxu1 %v3146_v2  ;;  %v3219_v2 = vld [vmem:[#allocation5 + $0x14] ss:$28 sps:$4 sm:$0xff]  }
 0x5d8   : > { %v1460_v57 = vpop.f32.mrf.mxu1 }
 0x5d9   : > { %v1461_v58 = vadd.f32 %v2413_v56, %v1460_v57  ;;  %v3204_v56 = vld [vmem:[#allocation5 + $0xf8] ss:$28 sps:$4 sm:$0xff]  }
 0x5da   : > { %v2924_v59 = vpop.f32.mrf.mxu1  ;;  %v3207_v57 = vld [vmem:[#allocation5 + $0xbc] ss:$28 sps:$4 sm:$0xff]  }
 0x5db   : > { %v1464_v60 = vmax.f32 %v1461_v58, 0.0  ;;  %v3205_v58 = vld [vmem:[#allocation5 + $0xb8] ss:$28 sps:$4 sm:$0xff]   ;;  %v3208_v59 = vld [vmem:[#allocation5 + $0xc0] ss:$28 sps:$4 sm:$0xff]  }
 0x5dd   : > { %2958 = vmatmul.mubr.f32.vlgmr.msra.gmra.mxu0 %v1464_v60  ;;  %v3211_v60 = vld [vmem:[#allocation5 + $0x84] ss:$28 sps:$4 sm:$0xff]  }
 0x5de   : > { %2042 = vmatpush1.bf16.msra.mxu0 %v3141_v0  ;;  %2073 = vmatprep.mubr.bf16.mxu0 %v3379_v38  ;;  %v3213_v0 = vld [vmem:[#allocation5 + $0x48] ss:$28 sps:$4 sm:$0xff]  }
 0x5df   : > { %2043 = vmatprep.subr.bf16.mxu0 %v3149_v3  ;;  %v3217_v3 = vld [vmem:[#allocation5 + $0x10] ss:$28 sps:$4 sm:$0xff]  }
 0x5e2   : > { %2044 = vmatpush1.bf16.msra.mxu0 %v3147_v4  ;;  %v3220_v4 = vld [vmem:[#allocation5 + $0x18] ss:$28 sps:$4 sm:$0xff]  }
 0x5e3   : > { %2045 = vmatprep.subr.bf16.mxu0 %v3155_v5  ;;  %v1718_v5 = vlaneseq }
 0x5e6   : > { %2046 = vmatpush1.bf16.msra.mxu0 %v3153_v6  ;;  %v1719_v6 = vshrl.u32 %v1718_v5, 7 }
 0x5e7   : > { %2047 = vmatprep.subr.bf16.mxu0 %v3161_v7 }
 0x5e8   : > { %v1720_v7 = vsub.s32 0, %v1719_v6 }
 0x5ea   : > { %2048 = vmatpush1.bf16.msra.mxu0 %v3159_v8  ;;  %v1728_v8 = vsub.s32 2, %v1719_v6 }
 0x5eb   : > { %2049 = vmatprep.subr.bf16.mxu0 %v3167_v9  ;;  %v1716_v9 = vld [vmem:[%s3946_s5] sm:$0xff] }
 0x5ee   : > { %2050 = vmatpush1.bf16.msra.mxu0 %v3165_v10  ;;  %v1724_v10 = vsub.s32 1, %v1719_v6 }
 0x5ef   : > { %2051 = vmatprep.subr.bf16.mxu0 %v3173_v11  ;;  %v1732_v11 = vsub.s32 3, %v1719_v6 }
 0x5f2   : > { %2052 = vmatpush1.bf16.msra.mxu0 %v3171_v12  ;;  %v1721_v12 = vrot.slane %v1716_v9, %v1720_v7 }
 0x5f3   : > { %2053 = vmatprep.subr.bf16.mxu0 %v3179_v13  ;;  %v1729_v13 = vrot.slane %v1716_v9, %v1728_v8 }
 0x5f6   : > { %2054 = vmatpush1.bf16.msra.mxu0 %v3177_v14  ;;  %v1725_v14 = vrot.slane %v1716_v9, %v1724_v10 }
 0x5f7   : > { %2055 = vmatprep.subr.bf16.mxu0 %v3185_v33 }
 0x5fa   : > { %2056 = vmatpush1.bf16.msra.mxu0 %v3183_v35 }
 0x5fb   : > { %2123 = vmatprep.subr.bf16.mxu0 %v3191_v37 }
 0x69d   : > { %v1553_v16 = vpop.f32.mrf.mxu0 }
 0x69e   : > { %v1554_v17 = vadd.f32 %v2414_v15, %v1553_v16  ;;  %v1733_v15 = vrot.slane %v1716_v9, %v1732_v11 }
 0x69f   : > { %v2959_v18 = vpop.f32.mrf.mxu0 }
 0x6a0   : > { %v1557_v20 = vmax.f32 %v1554_v17, 0.0 }
 0x6a2   : > { %2993 = vmatmul.mubr.f32.vlgmr.msra.gmra.mxu1 %v1557_v20 }
 0x6a3   : > { %2083 = vmatpush1.bf16.msra.mxu1 %v3144_v19  ;;  %2114 = vmatprep.mubr.bf16.mxu1 %v3379_v38 }
 0x6a4   : > { %2084 = vmatprep.subr.bf16.mxu1 %v3152_v21 }
 0x6a7   : > { %2085 = vmatpush1.bf16.msra.mxu1 %v3150_v22 }
 0x6a8   : > { %2086 = vmatprep.subr.bf16.mxu1 %v3158_v23 }
 0x6ab   : > { %2087 = vmatpush1.bf16.msra.mxu1 %v3156_v24 }
 0x6ac   : > { %2088 = vmatprep.subr.bf16.mxu1 %v3164_v25 }
 0x6af   : > { %2089 = vmatpush1.bf16.msra.mxu1 %v3162_v26 }
 0x6b0   : > { %2090 = vmatprep.subr.bf16.mxu1 %v3170_v27 }
 0x6b3   : > { %2091 = vmatpush1.bf16.msra.mxu1 %v3168_v28 }
 0x6b4   : > { %2092 = vmatprep.subr.bf16.mxu1 %v3176_v29 }
 0x6b7   : > { %2093 = vmatpush1.bf16.msra.mxu1 %v3174_v30 }
 0x6b8   : > { %2094 = vmatprep.subr.bf16.mxu1 %v3182_v31 }
 0x6bb   : > { %2095 = vmatpush1.bf16.msra.mxu1 %v3180_v32 }
 0x6bc   : > { %2096 = vmatprep.subr.bf16.mxu1 %v3188_v34 }
 0x6bf   : > { %2097 = vmatpush1.bf16.msra.mxu1 %v3186_v36 }
 0x6c0   : > { %2995 = vmatprep.subr.bf16.mxu1 %v3377_v39 }
 0x762   : > { %v1646_v41 = vpop.f32.mrf.mxu1 }
 0x763   : > { %v1647_v42 = vadd.f32 %v2415_v40, %v1646_v41 }
 0x764   : > { %v2994_v43 = vpop.f32.mrf.mxu1 }
 0x765   : > { %v1650_v44 = vmax.f32 %v1647_v42, 0.0 }
 0x767   : > { %v1651_v47 = vpack.c.bf16 %v1650_v44, %v1650_v44  ;;  %v1736_v44 = vsub.s32 4, %v1719_v6 }
 0x769   : > { %2074 = vmatmul.mubr.bf16.vlgmr.msra.gmra.mxu0 %v1651_v47  ;;  %2115 = vmatmul.mubr.bf16.vlgmr.msra.gmra.mxu1 %v1651_v47 }
 0x76a   : > { %2124 = vmatpush1.bf16.msra.mxu0 %v3189_v45  ;;  %2996 = vmatpush3.bf16.msra.mxu1 %v3192_v46  ;;  %v1744_v45 = vsub.s32 6, %v1719_v6  ;;  %v1740_v46 = vsub.s32 5, %v1719_v6 }
 0x76b   : > { %2125 = vmatprep.subr.bf16.mxu0 %v3195_v48  ;;  %2997 = vmatprep.subr.bf16.mxu1 %v3377_v39 }
 0x76c   : > { %2155 = vmatprep.mubr.bf16.mxu0 %v3379_v38  ;;  %3011 = vmatprep.mubr.msk.bf16.mxu1 %vm3378_vm0, %v3377_v39  ;;  %v1745_v48 = vrot.slane %v1716_v9, %v1744_v45 }
 0x76e   : > { %2126 = vmatpush1.bf16.msra.mxu0 %v3193_v49  ;;  %2998 = vmatpush3.bf16.msra.mxu1 %v3196_v50  ;;  %v1741_v49 = vrot.slane %v1716_v9, %v1740_v46 }
 0x76f   : > { %2127 = vmatprep.subr.bf16.mxu0 %v3199_v51  ;;  %2999 = vmatprep.subr.bf16.mxu1 %v3377_v39 }
 0x772   : > { %2128 = vmatpush1.bf16.msra.mxu0 %v3197_v52  ;;  %3000 = vmatpush3.bf16.msra.mxu1 %v3200_v53 }
 0x773   : > { %2129 = vmatprep.subr.bf16.mxu0 %v3203_v54  ;;  %3001 = vmatprep.subr.bf16.mxu1 %v3377_v39 }
 0x776   : > { %2130 = vmatpush1.bf16.msra.mxu0 %v3201_v55  ;;  %3002 = vmatpush3.bf16.msra.mxu1 %v3204_v56 }
 0x777   : > { %2131 = vmatprep.subr.bf16.mxu0 %v3207_v57  ;;  %3003 = vmatprep.subr.bf16.mxu1 %v3377_v39 }
 0x77a   : > { %2132 = vmatpush1.bf16.msra.mxu0 %v3205_v58  ;;  %3004 = vmatpush3.bf16.msra.mxu1 %v3208_v59 }
 0x77b   : > { %2133 = vmatprep.subr.bf16.mxu0 %v3211_v60  ;;  %3005 = vmatprep.subr.bf16.mxu1 %v3377_v39 }
 0x77e   : > { %2134 = vmatpush1.bf16.msra.mxu0 %v3209_v61  ;;  %3006 = vmatpush3.bf16.msra.mxu1 %v3212_v62 }
 0x77f   : > { %2135 = vmatprep.subr.bf16.mxu0 %v3215_v63  ;;  %3007 = vmatprep.subr.bf16.mxu1 %v3377_v39 }
 0x782   : > { %2136 = vmatpush1.bf16.msra.mxu0 %v3213_v0  ;;  %3008 = vmatpush3.bf16.msra.mxu1 %v3216_v1 }
 0x783   : > { %2137 = vmatprep.subr.bf16.mxu0 %v3219_v2  ;;  %3009 = vmatprep.subr.bf16.mxu1 %v3377_v39 }
 0x786   : > { %2138 = vmatpush1.bf16.msra.mxu0 %v3217_v3  ;;  %3010 = vmatpush3.bf16.msra.mxu1 %v3220_v4 }
 0x789   : > { %2156 = vmatmul.mubr.bf16.vlgmr.msra.gmra.mxu0 %v1651_v47  ;;  %3012 = vmatmul.mubr.bf16.vlgmr.msra.gmra.mxu1 %v1651_v47  ;;  %v1737_v47 = vrot.slane %v1716_v9, %v1736_v44 }
 0x829   : > { %v2075_v16 = vpop.f32.mrf.mxu0  ;;  %v2116_v39 = vpop.f32.mrf.mxu1 }
 0x82a   : > { %v2076_v17 = vadd.f32 %v2075_v16, %v1721_v12  ;;  %v2117_v18 = vadd.f32 %v2116_v39, %v1729_v13 }
 0x82b   : > { %v2077_v19 = vpop.f32.mrf.mxu0  ;;  %v2118_v20 = vpop.f32.mrf.mxu1 }
 0x82c   : > { %v2204_v21 = vsub.f32 0.0, %v2076_v17  ;;  %v2206_v22 = vsub.f32 0.0, %v2117_v18  ;;  %v2078_v23 = vadd.f32 %v2077_v19, %v1725_v14  ;;  %v2119_v24 = vadd.f32 %v2118_v20, %v1733_v15 }
 0x82d   : > { %v2079_v25 = vpop.f32.mrf.mxu0  ;;  %v2120_v26 = vpop.f32.mrf.mxu1 }
 0x82e   : > { %v2211_v27 = vmul.f32 1.442695, %v2204_v21  ;;  %v2215_v28 = vmul.f32 1.442695, %v2206_v22  ;;  %v2205_v29 = vsub.f32 0.0, %v2078_v23  ;;  %v2207_v30 = vsub.f32 0.0, %v2119_v24 }
 0x82f   : > { %v2080_v31 = vpop.f32.mrf.mxu0  ;;  %v2121_v32 = vpop.f32.mrf.mxu1 }
 0x830   : > { %3221 = vpow2.f32 %v2211_v27  ;;  %v2213_v33 = vmul.f32 1.442695, %v2205_v29  ;;  %v2217_v34 = vmul.f32 1.442695, %v2207_v30 }
 0x831   : > { %3223 = vpow2.f32 %v2215_v28 }
 0x832   : > { %3225 = vpow2.f32 %v2213_v33 }
 0x833   : > { %3227 = vpow2.f32 %v2217_v34 }
 0x83d   : > { %v3222_v35 = vpop.eup %3221 }
 0x83e   : > { %v3224_v36 = vpop.eup %3223  ;;  %v2225_v37 = vadd.f32 1.0, %v3222_v35 }
 0x83f   : > { %v3226_v38 = vpop.eup %3225  ;;  %v2227_v40 = vadd.f32 1.0, %v3224_v36 }
 0x840   : > { %v3228_v41 = vpop.eup %3227  ;;  %3229 = vrcp.f32 %v2225_v37  ;;  %v2226_v42 = vadd.f32 1.0, %v3226_v38 }
 0x841   : > { %3231 = vrcp.f32 %v2227_v40  ;;  %v2228_v43 = vadd.f32 1.0, %v3228_v41 }
 0x842   : > { %3233 = vrcp.f32 %v2226_v42 }
 0x843   : > { %3235 = vrcp.f32 %v2228_v43 }
 0x849   : > { %v2157_v50 = vpop.f32.mrf.mxu0  ;;  %v2198_v51 = vpop.f32.mrf.mxu1 }
 0x84a   : > { %v2158_v52 = vadd.f32 %v2157_v50, %v1737_v47  ;;  %v2199_v53 = vadd.f32 %v2198_v51, %v1745_v48 }
 0x84b   : > { %v2159_v54 = vpop.f32.mrf.mxu0  ;;  %v3013_v55 = vpop.f32.mrf.mxu1 }
 0x84c   : > { %v2208_v56 = vsub.f32 0.0, %v2158_v52  ;;  %v2210_v57 = vsub.f32 0.0, %v2199_v53  ;;  %v2160_v58 = vadd.f32 %v2159_v54, %v1741_v49 }
 0x84d   : > { %v3230_v59 = vpop.eup %3229  ;;  %v2161_v60 = vpop.f32.mrf.mxu0 }
 0x84e   : > { %v2201_v61 = vpop.f32.mrf.mxu1  ;;  %v3232_v62 = vpop.eup %3231  ;;  %v2219_v63 = vmul.f32 1.442695, %v2208_v56  ;;  %v2223_v0 = vmul.f32 1.442695, %v2210_v57  ;;  %v2209_v1 = vsub.f32 0.0, %v2160_v58  ;;  %2239 = vst [vmem:[%s3884_s17] sm:$0xff] %v3230_v59 }
 0x84f   : > { %v3234_v2 = vpop.eup %3233  ;;  %v2162_v3 = vpop.f32.mrf.mxu0  ;;  %2241 = vst [vmem:[%s3884_s17 + $0x10] sm:$0xff] %v3232_v62 }
 0x850   : > { %v3014_v4 = vpop.f32.mrf.mxu1  ;;  %v3236_v5 = vpop.eup %3235  ;;  %3237 = vpow2.f32 %v2219_v63  ;;  %v2221_v6 = vmul.f32 1.442695, %v2209_v1  ;;  %2240 = vst [vmem:[%s3884_s17 + $0x8] sm:$0xff] %v3234_v2 }
 0x851   : > { %3239 = vpow2.f32 %v2223_v0  ;;  %2242 = vst [vmem:[%s3884_s17 + $0x18] sm:$0xff] %v3236_v5 }
 0x852   : > { %3241 = vpow2.f32 %v2221_v6 }
 0x85d   : > { %v3238_v7 = vpop.eup %3237 }
 0x85e   : > { %v3240_v8 = vpop.eup %3239  ;;  %v2229_v9 = vadd.f32 1.0, %v3238_v7 }
 0x85f   : > { %v3242_v10 = vpop.eup %3241  ;;  %v2231_v11 = vadd.f32 1.0, %v3240_v8 }
 0x860   : > { %3243 = vrcp.f32 %v2229_v9  ;;  %v2230_v12 = vadd.f32 1.0, %v3242_v10 }
 0x861   : > { %3245 = vrcp.f32 %v2231_v11 }
 0x862   : > { %3247 = vrcp.f32 %v2230_v12 }
 0x86d   : > { %v3244_v13 = vpop.eup %3243 }
 0x86e   : > { %v3246_v14 = vpop.eup %3245  ;;  %2243 = vst [vmem:[%s3884_s17 + $0x20] sm:$0xff] %v3244_v13 }
 0x86f   : > { %v3248_v15 = vpop.eup %3247  ;;  %2245 = vst [vmem:[%s3884_s17 + $0x30] sm:$0xff] %v3246_v14 }
 0x870   : > { %2244 = vst [vmem:[%s3884_s17 + $0x28] sm:$0xff] %v3248_v15 }
 0x871   : > { %3314 = shalt.err (!%p3311_p3)
}
 0x872   : > { %s3315_s13 = scalar_lea.hbm %s3896_s28, 896  ;;  %s3319_s15 = scalar_lea.hbm %s3947_s6, 2688 }
 0x873   : > { %p3316_p2 = scmp.ne.s32.totalorder %s3896_s28, %s3315_s13  ;;  %p3320_p6 = scmp.lt.s32.totalorder %s3896_s28, %s3947_s6 }
 0x874   : > { %p3321_p9 = scmp.lt.s32.totalorder %s3319_s15, %s3315_s13 }
 0x875   : > { %p3317_p4 = pnand %p3316_p2, %p3454_p5 }
 0x876   : > { %p3322_p10 = por %p3321_p9, %p3320_p6 }
 0x877   : > { %p3318_p13 = pneg %p3317_p4 }
 0x879   : > { %p3323_p12 = pnand %p3322_p10, %p3318_p13 }
 0x87b   : > { %3326 = shalt.err (!%p3323_p12)
}
 0x87c   : > { %3026 = dma.vmem_to_hbm [thread:$0]  (%p3454_p5), %s3898_s18, 896, %s3896_s28, %s2247_s29  }
 0x87d PF: > { %p3043_p7 = scmp.ge.s32.totalorder %s3369_s24, 2  ;;  %s2273_s19 = sand.u32 1, %s3357_s21  }
 0x87e   : > { %p3957_p8 = scmp.ne.s32.totalorder %s3950_s8, 0  ;;  %s2274_s20 = scalar_lea.sflag [#allocation4], %s2273_s19 }
 0x880   : > { %p3036_p11 = pnand %p3043_p7, %p3957_p8 }
 0x882   : > { %p3037_p0 = pneg %p3036_p11 }
 0x884   : > { %3352 = dma.done.wait (%p3037_p0), %s2274_s20, 896  }
 0x885   : > { %3354 = vsyncadd (%p3037_p0), %s2274_s20, 4294966400  ;;  %p18_p1 = scmp.ge.s32.totalorder %s3441_s27, 5   ;;  %s3958_s21 = smov %s3361_s22 }
 0x886   : > { %s3959_s22 = smov %s3365_s23  ;;  %s3960_s23 = smov %s3452_s30 }
 0x887   : > { %s3961_s24 = smov %s3441_s27  ;;  %20 = sbr.rel (!%p18_p1) target bundleno = 5 (0x5), region = 95 }
 0x88c   :  { %2279 = vsyncpa [#allocation3], 1 }
 0x88d   :  { %2281 = vsyncpa [#allocation3 + $0x1], 1 }
 0x88e   :  { %2282 = vsyncpa [#allocation6], 1 }
 0x88f   :  { %2283 = vsyncpa [#allocation4], 1 }
 0x890   :  { %2285 = vsyncpa [#allocation4 + $0x1], 1 }

</bundles_post_ra>
